<compile_context>
chip_gen: v5e
topology: v5e:2x2
jax: 0.10.0
libtpu: 0.0.40
codegen_flags: <defaults>
</compile_context>

<pallas_src>
import jax
import jax.numpy as jnp
from jax import lax
from jax.experimental import pallas as pl
from jax.experimental.pallas import tpu as pltpu

# ---- small shapes consistent with the module ----
B, N, DIM = 2, 16, 64
EXPANSION = 2
INNER = DIM * EXPANSION                    # 128
K = 31                                     # default kernel_size
PAD_L = K // 2                             # 15
PAD_R = K // 2 - (K + 1) % 2               # 15  (calc_same_padding)
EPS = 1e-5
BN = B * N                                 # 32 rows, flattened batch*seq


# ----------------- fused kernel -----------------
def conformer_conv_kernel(x_ref, gln_ref, bln_ref, w1t_ref, b1_ref,
                          wd_ref, bd_ref, gbn_ref, bbn_ref, w2t_ref, b2_ref,
                          o_ref):
    # x_ref: (B*N, DIM), o_ref: (B*N, DIM)

    # --- LayerNorm over channels (biased variance, eps=1e-5) ---
    x = x_ref[...]                                           # (32, 64)
    mu = jnp.mean(x, axis=-1, keepdims=True)
    xc = x - mu
    var = jnp.mean(xc * xc, axis=-1, keepdims=True)
    ln = xc * lax.rsqrt(var + EPS) * gln_ref[...] + bln_ref[...]

    # --- pointwise Conv1d(dim, 2*inner, 1) + GLU ---
    y = jnp.dot(ln, w1t_ref[...], preferred_element_type=jnp.float32) + b1_ref[...]
    g = y[:, :INNER] * jax.nn.sigmoid(y[:, INNER:])          # (32, 128)

    # --- depthwise Conv1d(inner, inner, K, groups=inner), "same" padding ---
    # Output row r = b*N + n, tap k reads source row r + k - PAD_L.  The source
    # is valid only while it stays inside the same batch element:
    #   0 <= n + k - PAD_L < N   <=>   PAD_L - k <= n < PAD_L - k + N.
    # The shift is expressed as an XLU sublane rotation of the flat slab; rows
    # that would cross a batch boundary (or fall into the zero "same" padding)
    # are masked out, which reproduces per-batch zero padding exactly.
    n_local = lax.broadcasted_iota(jnp.int32, (BN, 1), 0) % N
    acc = jnp.zeros((BN, INNER), jnp.float32)
    for k in range(K):                                       # static taps
        if k == PAD_L:
            contrib = g                                      # zero shift, full mask
        else:
            shifted = pltpu.roll(g, shift=(PAD_L - k) % BN, axis=0)
            lo = PAD_L - k
            mask = (n_local >= lo) & (n_local < lo + N)
            contrib = jnp.where(mask, shifted, 0.0)
        acc = acc + contrib * wd_ref[k:k + 1, :]
    dw = acc + bd_ref[...]                                   # (32, 128)

    # --- BatchNorm1d (training mode, fresh module): batch stats over B*N ---
    mu2 = jnp.mean(dw, axis=0, keepdims=True)
    dc = dw - mu2
    var2 = jnp.mean(dc * dc, axis=0, keepdims=True)
    bn = dc * lax.rsqrt(var2 + EPS) * gbn_ref[...] + bbn_ref[...]

    # --- Swish + pointwise Conv1d(inner, dim, 1) ---
    s = bn * jax.nn.sigmoid(bn)
    out = jnp.dot(s, w2t_ref[...], preferred_element_type=jnp.float32) + b2_ref[...]
    o_ref[...] = out
    # TODO(synk): nn.Dropout(p=0.0) is an identity; omitted.


# ----------------- wrapper -----------------
def conformer_conv_module(x, params):
    g_ln, b_ln, w1, b1, wd, bd, g_bn, b_bn, w2, b2 = params

    # host-side weight re-layout (glue, free at trace time)
    w1t = w1[:, :, 0].T                     # (DIM, 2*INNER)
    wd_kc = wd[:, 0, :].T                   # (K, INNER)
    w2t = w2[:, :, 0].T                     # (INNER, DIM)
    x2 = x.reshape(BN, DIM)                 # flatten batch into the matmul M dim

    out2 = pl.pallas_call(
        conformer_conv_kernel,
        out_shape=jax.ShapeDtypeStruct((BN, DIM), jnp.float32),
    )(x2,
      g_ln.reshape(1, DIM), b_ln.reshape(1, DIM),
      w1t, b1.reshape(1, -1),
      wd_kc, bd.reshape(1, -1),
      g_bn.reshape(1, -1), b_bn.reshape(1, -1),
      w2t, b2.reshape(1, -1))
    return out2.reshape(B, N, DIM)


# ----------------- pure-JAX reference (for verification) -----------------
def reference(x, params):
    g_ln, b_ln, w1, b1, wd, bd, g_bn, b_bn, w2, b2 = params
    mu = x.mean(-1, keepdims=True)
    var = ((x - mu) ** 2).mean(-1, keepdims=True)
    ln = (x - mu) / jnp.sqrt(var + EPS) * g_ln + b_ln
    y = jnp.einsum('bnd,od->bno', ln, w1[:, :, 0]) + b1
    out, gate = y[..., :INNER], y[..., INNER:]
    g = out * jax.nn.sigmoid(gate)
    gp = jnp.pad(g, ((0, 0), (PAD_L, PAD_R), (0, 0)))
    dw = jnp.zeros((B, N, INNER), jnp.float32)
    for k in range(K):
        dw = dw + gp[:, k:k + N, :] * wd[:, 0, k]
    dw = dw + bd
    mu2 = dw.mean((0, 1))
    var2 = ((dw - mu2) ** 2).mean((0, 1))
    bn = (dw - mu2) / jnp.sqrt(var2 + EPS) * g_bn + b_bn
    s = bn * jax.nn.sigmoid(bn)
    return jnp.einsum('bnc,dc->bnd', s, w2[:, :, 0]) + b2


if __name__ == "__main__":
    key = jax.random.PRNGKey(0)
    keys = jax.random.split(key, 11)

    x = jax.random.normal(keys[0], (B, N, DIM), jnp.float32)

    # deterministic parameter init (shapes follow the PyTorch module)
    g_ln = jax.random.normal(keys[1], (DIM,), jnp.float32) * 0.1 + 1.0
    b_ln = jax.random.normal(keys[2], (DIM,), jnp.float32) * 0.1
    w1 = jax.random.normal(keys[3], (2 * INNER, DIM, 1), jnp.float32) * 0.05
    b1 = jax.random.normal(keys[4], (2 * INNER,), jnp.float32) * 0.05
    wd = jax.random.normal(keys[5], (INNER, 1, K), jnp.float32) * 0.05
    bd = jax.random.normal(keys[6], (INNER,), jnp.float32) * 0.05
    g_bn = jax.random.normal(keys[7], (INNER,), jnp.float32) * 0.1 + 1.0
    b_bn = jax.random.normal(keys[8], (INNER,), jnp.float32) * 0.1
    w2 = jax.random.normal(keys[9], (DIM, INNER, 1), jnp.float32) * 0.05
    b2 = jax.random.normal(keys[10], (DIM,), jnp.float32) * 0.05

    params = (g_ln, b_ln, w1, b1, wd, bd, g_bn, b_bn, w2, b2)

    out = conformer_conv_module(x, params)
    out = jax.block_until_ready(out)

    ref = reference(x, params)
    assert out.shape == (B, N, DIM)
    assert jnp.allclose(out, ref, atol=1e-4, rtol=1e-4), float(jnp.max(jnp.abs(out - ref)))

    print("KERNEL_OK")
</pallas_src>

<mosaic_0001>
module attributes {stable_mosaic.version = 11 : i64} {
  func.func @conformer_conv_kernel(%arg0: memref<32x64xf32, #tpu.memory_space<vmem>>, %arg1: memref<1x64xf32, #tpu.memory_space<vmem>>, %arg2: memref<1x64xf32, #tpu.memory_space<vmem>>, %arg3: memref<64x256xf32, #tpu.memory_space<vmem>>, %arg4: memref<1x256xf32, #tpu.memory_space<vmem>>, %arg5: memref<31x128xf32, #tpu.memory_space<vmem>>, %arg6: memref<1x128xf32, #tpu.memory_space<vmem>>, %arg7: memref<1x128xf32, #tpu.memory_space<vmem>>, %arg8: memref<1x128xf32, #tpu.memory_space<vmem>>, %arg9: memref<128x64xf32, #tpu.memory_space<vmem>>, %arg10: memref<1x64xf32, #tpu.memory_space<vmem>>, %arg11: memref<32x64xf32, #tpu.memory_space<vmem>>) attributes {dimension_semantics = [], scalar_prefetch = 0 : i64, scratch_operands = 0 : i64, tpu.core_type = #tpu.core_type<tc>} {
    %c0 = arith.constant 0 : index
    %c0_0 = arith.constant 0 : index
    %0 = vector.load %arg0[%c0, %c0_0] : memref<32x64xf32, #tpu.memory_space<vmem>>, vector<32x64xf32>
    %cst = arith.constant dense<0.000000e+00> : vector<32xf32>
    %1 = vector.multi_reduction <add>, %0, %cst [1] : vector<32x64xf32> to vector<32xf32>
    %2 = vector.shape_cast %1 : vector<32xf32> to vector<32x1xf32>
    %cst_1 = arith.constant 6.400000e+01 : f32
    %3 = vector.broadcast %cst_1 : f32 to vector<32x1xf32>
    %4 = arith.divf %2, %3 : vector<32x1xf32>
    %5 = vector.broadcast %4 : vector<32x1xf32> to vector<32x64xf32>
    %6 = arith.subf %0, %5 : vector<32x64xf32>
    %7 = arith.mulf %6, %6 : vector<32x64xf32>
    %cst_2 = arith.constant dense<0.000000e+00> : vector<32xf32>
    %8 = vector.multi_reduction <add>, %7, %cst_2 [1] : vector<32x64xf32> to vector<32xf32>
    %9 = vector.shape_cast %8 : vector<32xf32> to vector<32x1xf32>
    %cst_3 = arith.constant 6.400000e+01 : f32
    %10 = vector.broadcast %cst_3 : f32 to vector<32x1xf32>
    %11 = arith.divf %9, %10 : vector<32x1xf32>
    %cst_4 = arith.constant 9.99999974E-6 : f32
    %12 = vector.broadcast %cst_4 : f32 to vector<32x1xf32>
    %13 = arith.addf %11, %12 : vector<32x1xf32>
    %14 = math.rsqrt %13 : vector<32x1xf32>
    %15 = vector.broadcast %14 : vector<32x1xf32> to vector<32x64xf32>
    %16 = arith.mulf %6, %15 : vector<32x64xf32>
    %c0_5 = arith.constant 0 : index
    %c0_6 = arith.constant 0 : index
    %17 = vector.load %arg1[%c0_5, %c0_6] : memref<1x64xf32, #tpu.memory_space<vmem>>, vector<1x64xf32>
    %18 = vector.broadcast %17 : vector<1x64xf32> to vector<32x64xf32>
    %19 = arith.mulf %16, %18 : vector<32x64xf32>
    %c0_7 = arith.constant 0 : index
    %c0_8 = arith.constant 0 : index
    %20 = vector.load %arg2[%c0_7, %c0_8] : memref<1x64xf32, #tpu.memory_space<vmem>>, vector<1x64xf32>
    %21 = vector.broadcast %20 : vector<1x64xf32> to vector<32x64xf32>
    %22 = arith.addf %19, %21 : vector<32x64xf32>
    %c0_9 = arith.constant 0 : index
    %c0_10 = arith.constant 0 : index
    %23 = vector.load %arg3[%c0_9, %c0_10] : memref<64x256xf32, #tpu.memory_space<vmem>>, vector<64x256xf32>
    %cst_11 = arith.constant dense<0.000000e+00> : vector<32x256xf32>
    %24 = tpu.matmul %22, %23, %cst_11 {dimension_numbers = #tpu.dot_dimension_numbers<[1], [0], [0], [1], [0, 0, 1, 1], [], []>} : vector<32x64xf32>, vector<64x256xf32>, vector<32x256xf32> -> vector<32x256xf32>
    %c0_12 = arith.constant 0 : index
    %c0_13 = arith.constant 0 : index
    %25 = vector.load %arg4[%c0_12, %c0_13] : memref<1x256xf32, #tpu.memory_space<vmem>>, vector<1x256xf32>
    %26 = vector.broadcast %25 : vector<1x256xf32> to vector<32x256xf32>
    %27 = arith.addf %24, %26 : vector<32x256xf32>
    %28 = vector.extract_strided_slice %27 {offsets = [0, 0], sizes = [32, 128], strides = [1, 1]} : vector<32x256xf32> to vector<32x128xf32>
    %29 = vector.extract_strided_slice %27 {offsets = [0, 128], sizes = [32, 128], strides = [1, 1]} : vector<32x256xf32> to vector<32x128xf32>
    %30 = arith.negf %29 : vector<32x128xf32>
    %31 = math.exp %30 : vector<32x128xf32>
    %cst_14 = arith.constant 1.000000e+00 : f32
    %32 = vector.broadcast %cst_14 : f32 to vector<32x128xf32>
    %33 = arith.addf %32, %31 : vector<32x128xf32>
    %34 = arith.divf %32, %33 : vector<32x128xf32>
    %35 = arith.mulf %28, %34 : vector<32x128xf32>
    %36 = tpu.iota {dimensions = array<i32: 0>} : vector<32x1xi32>
    %c16_i32 = arith.constant 16 : i32
    %c0_i32 = arith.constant 0 : i32
    %37 = arith.cmpi eq, %c16_i32, %c0_i32 : i32
    %c1_i32 = arith.constant 1 : i32
    %38 = arith.select %37, %c1_i32, %c16_i32 : i32
    %39 = vector.broadcast %38 : i32 to vector<32x1xi32>
    %40 = arith.remsi %36, %39 : vector<32x1xi32>
    %c0_i32_15 = arith.constant 0 : i32
    %41 = vector.broadcast %c0_i32_15 : i32 to vector<32x1xi32>
    %42 = arith.cmpi ne, %40, %41 : vector<32x1xi32>
    %c0_i32_16 = arith.constant 0 : i32
    %43 = vector.broadcast %c0_i32_16 : i32 to vector<32x1xi32>
    %44 = arith.cmpi slt, %40, %43 : vector<32x1xi32>
    %c0_i32_17 = arith.constant 0 : i32
    %45 = arith.cmpi slt, %38, %c0_i32_17 : i32
    %46 = vector.broadcast %45 : i1 to vector<32x1xi1>
    %47 = vector.broadcast %46 : vector<32x1xi1> to vector<32x1xi1>
    %48 = arith.xori %44, %47 : vector<32x1xi1>
    %49 = arith.andi %48, %42 : vector<32x1xi1>
    %50 = vector.broadcast %38 : i32 to vector<32x1xi32>
    %51 = arith.addi %40, %50 : vector<32x1xi32>
    %52 = arith.select %49, %51, %40 : vector<32x1xi1>, vector<32x1xi32>
    %cst_18 = arith.constant 0.000000e+00 : f32
    %53 = vector.broadcast %cst_18 : f32 to vector<32x128xf32>
    %c15_i32 = arith.constant 15 : i32
    %54 = tpu.dynamic_rotate %35 by %c15_i32 dim 0 : vector<32x128xf32>, i32 -> vector<32x128xf32>
    %c15_i32_19 = arith.constant 15 : i32
    %55 = vector.broadcast %c15_i32_19 : i32 to vector<32x1xi32>
    %56 = arith.cmpi sge, %52, %55 : vector<32x1xi32>
    %c31_i32 = arith.constant 31 : i32
    %57 = vector.broadcast %c31_i32 : i32 to vector<32x1xi32>
    %58 = arith.cmpi slt, %52, %57 : vector<32x1xi32>
    %59 = arith.andi %56, %58 : vector<32x1xi1>
    %cst_20 = arith.constant 0.000000e+00 : f32
    %60 = vector.shape_cast %59 : vector<32x1xi1> to vector<32x1xi1>
    %61 = vector.broadcast %60 : vector<32x1xi1> to vector<32x128xi1>
    %62 = vector.broadcast %cst_20 : f32 to vector<32x128xf32>
    %63 = arith.select %61, %54, %62 : vector<32x128xi1>, vector<32x128xf32>
    %c0_21 = arith.constant 0 : index
    %c0_22 = arith.constant 0 : index
    %64 = vector.load %arg5[%c0_21, %c0_22] : memref<31x128xf32, #tpu.memory_space<vmem>>, vector<1x128xf32>
    %65 = vector.broadcast %64 : vector<1x128xf32> to vector<32x128xf32>
    %66 = arith.mulf %63, %65 : vector<32x128xf32>
    %67 = arith.addf %53, %66 : vector<32x128xf32>
    %c14_i32 = arith.constant 14 : i32
    %68 = tpu.dynamic_rotate %35 by %c14_i32 dim 0 : vector<32x128xf32>, i32 -> vector<32x128xf32>
    %c14_i32_23 = arith.constant 14 : i32
    %69 = vector.broadcast %c14_i32_23 : i32 to vector<32x1xi32>
    %70 = arith.cmpi sge, %52, %69 : vector<32x1xi32>
    %c30_i32 = arith.constant 30 : i32
    %71 = vector.broadcast %c30_i32 : i32 to vector<32x1xi32>
    %72 = arith.cmpi slt, %52, %71 : vector<32x1xi32>
    %73 = arith.andi %70, %72 : vector<32x1xi1>
    %cst_24 = arith.constant 0.000000e+00 : f32
    %74 = vector.shape_cast %73 : vector<32x1xi1> to vector<32x1xi1>
    %75 = vector.broadcast %74 : vector<32x1xi1> to vector<32x128xi1>
    %76 = vector.broadcast %cst_24 : f32 to vector<32x128xf32>
    %77 = arith.select %75, %68, %76 : vector<32x128xi1>, vector<32x128xf32>
    %c1 = arith.constant 1 : index
    %c0_25 = arith.constant 0 : index
    %78 = vector.load %arg5[%c1, %c0_25] : memref<31x128xf32, #tpu.memory_space<vmem>>, vector<1x128xf32>
    %79 = vector.broadcast %78 : vector<1x128xf32> to vector<32x128xf32>
    %80 = arith.mulf %77, %79 : vector<32x128xf32>
    %81 = arith.addf %67, %80 : vector<32x128xf32>
    %c13_i32 = arith.constant 13 : i32
    %82 = tpu.dynamic_rotate %35 by %c13_i32 dim 0 : vector<32x128xf32>, i32 -> vector<32x128xf32>
    %c13_i32_26 = arith.constant 13 : i32
    %83 = vector.broadcast %c13_i32_26 : i32 to vector<32x1xi32>
    %84 = arith.cmpi sge, %52, %83 : vector<32x1xi32>
    %c29_i32 = arith.constant 29 : i32
    %85 = vector.broadcast %c29_i32 : i32 to vector<32x1xi32>
    %86 = arith.cmpi slt, %52, %85 : vector<32x1xi32>
    %87 = arith.andi %84, %86 : vector<32x1xi1>
    %cst_27 = arith.constant 0.000000e+00 : f32
    %88 = vector.shape_cast %87 : vector<32x1xi1> to vector<32x1xi1>
    %89 = vector.broadcast %88 : vector<32x1xi1> to vector<32x128xi1>
    %90 = vector.broadcast %cst_27 : f32 to vector<32x128xf32>
    %91 = arith.select %89, %82, %90 : vector<32x128xi1>, vector<32x128xf32>
    %c2 = arith.constant 2 : index
    %c0_28 = arith.constant 0 : index
    %92 = vector.load %arg5[%c2, %c0_28] : memref<31x128xf32, #tpu.memory_space<vmem>>, vector<1x128xf32>
    %93 = vector.broadcast %92 : vector<1x128xf32> to vector<32x128xf32>
    %94 = arith.mulf %91, %93 : vector<32x128xf32>
    %95 = arith.addf %81, %94 : vector<32x128xf32>
    %c12_i32 = arith.constant 12 : i32
    %96 = tpu.dynamic_rotate %35 by %c12_i32 dim 0 : vector<32x128xf32>, i32 -> vector<32x128xf32>
    %c12_i32_29 = arith.constant 12 : i32
    %97 = vector.broadcast %c12_i32_29 : i32 to vector<32x1xi32>
    %98 = arith.cmpi sge, %52, %97 : vector<32x1xi32>
    %c28_i32 = arith.constant 28 : i32
    %99 = vector.broadcast %c28_i32 : i32 to vector<32x1xi32>
    %100 = arith.cmpi slt, %52, %99 : vector<32x1xi32>
    %101 = arith.andi %98, %100 : vector<32x1xi1>
    %cst_30 = arith.constant 0.000000e+00 : f32
    %102 = vector.shape_cast %101 : vector<32x1xi1> to vector<32x1xi1>
    %103 = vector.broadcast %102 : vector<32x1xi1> to vector<32x128xi1>
    %104 = vector.broadcast %cst_30 : f32 to vector<32x128xf32>
    %105 = arith.select %103, %96, %104 : vector<32x128xi1>, vector<32x128xf32>
    %c3 = arith.constant 3 : index
    %c0_31 = arith.constant 0 : index
    %106 = vector.load %arg5[%c3, %c0_31] : memref<31x128xf32, #tpu.memory_space<vmem>>, vector<1x128xf32>
    %107 = vector.broadcast %106 : vector<1x128xf32> to vector<32x128xf32>
    %108 = arith.mulf %105, %107 : vector<32x128xf32>
    %109 = arith.addf %95, %108 : vector<32x128xf32>
    %c11_i32 = arith.constant 11 : i32
    %110 = tpu.dynamic_rotate %35 by %c11_i32 dim 0 : vector<32x128xf32>, i32 -> vector<32x128xf32>
    %c11_i32_32 = arith.constant 11 : i32
    %111 = vector.broadcast %c11_i32_32 : i32 to vector<32x1xi32>
    %112 = arith.cmpi sge, %52, %111 : vector<32x1xi32>
    %c27_i32 = arith.constant 27 : i32
    %113 = vector.broadcast %c27_i32 : i32 to vector<32x1xi32>
    %114 = arith.cmpi slt, %52, %113 : vector<32x1xi32>
    %115 = arith.andi %112, %114 : vector<32x1xi1>
    %cst_33 = arith.constant 0.000000e+00 : f32
    %116 = vector.shape_cast %115 : vector<32x1xi1> to vector<32x1xi1>
    %117 = vector.broadcast %116 : vector<32x1xi1> to vector<32x128xi1>
    %118 = vector.broadcast %cst_33 : f32 to vector<32x128xf32>
    %119 = arith.select %117, %110, %118 : vector<32x128xi1>, vector<32x128xf32>
    %c4 = arith.constant 4 : index
    %c0_34 = arith.constant 0 : index
    %120 = vector.load %arg5[%c4, %c0_34] : memref<31x128xf32, #tpu.memory_space<vmem>>, vector<1x128xf32>
    %121 = vector.broadcast %120 : vector<1x128xf32> to vector<32x128xf32>
    %122 = arith.mulf %119, %121 : vector<32x128xf32>
    %123 = arith.addf %109, %122 : vector<32x128xf32>
    %c10_i32 = arith.constant 10 : i32
    %124 = tpu.dynamic_rotate %35 by %c10_i32 dim 0 : vector<32x128xf32>, i32 -> vector<32x128xf32>
    %c10_i32_35 = arith.constant 10 : i32
    %125 = vector.broadcast %c10_i32_35 : i32 to vector<32x1xi32>
    %126 = arith.cmpi sge, %52, %125 : vector<32x1xi32>
    %c26_i32 = arith.constant 26 : i32
    %127 = vector.broadcast %c26_i32 : i32 to vector<32x1xi32>
    %128 = arith.cmpi slt, %52, %127 : vector<32x1xi32>
    %129 = arith.andi %126, %128 : vector<32x1xi1>
    %cst_36 = arith.constant 0.000000e+00 : f32
    %130 = vector.shape_cast %129 : vector<32x1xi1> to vector<32x1xi1>
    %131 = vector.broadcast %130 : vector<32x1xi1> to vector<32x128xi1>
    %132 = vector.broadcast %cst_36 : f32 to vector<32x128xf32>
    %133 = arith.select %131, %124, %132 : vector<32x128xi1>, vector<32x128xf32>
    %c5 = arith.constant 5 : index
    %c0_37 = arith.constant 0 : index
    %134 = vector.load %arg5[%c5, %c0_37] : memref<31x128xf32, #tpu.memory_space<vmem>>, vector<1x128xf32>
    %135 = vector.broadcast %134 : vector<1x128xf32> to vector<32x128xf32>
    %136 = arith.mulf %133, %135 : vector<32x128xf32>
    %137 = arith.addf %123, %136 : vector<32x128xf32>
    %c9_i32 = arith.constant 9 : i32
    %138 = tpu.dynamic_rotate %35 by %c9_i32 dim 0 : vector<32x128xf32>, i32 -> vector<32x128xf32>
    %c9_i32_38 = arith.constant 9 : i32
    %139 = vector.broadcast %c9_i32_38 : i32 to vector<32x1xi32>
    %140 = arith.cmpi sge, %52, %139 : vector<32x1xi32>
    %c25_i32 = arith.constant 25 : i32
    %141 = vector.broadcast %c25_i32 : i32 to vector<32x1xi32>
    %142 = arith.cmpi slt, %52, %141 : vector<32x1xi32>
    %143 = arith.andi %140, %142 : vector<32x1xi1>
    %cst_39 = arith.constant 0.000000e+00 : f32
    %144 = vector.shape_cast %143 : vector<32x1xi1> to vector<32x1xi1>
    %145 = vector.broadcast %144 : vector<32x1xi1> to vector<32x128xi1>
    %146 = vector.broadcast %cst_39 : f32 to vector<32x128xf32>
    %147 = arith.select %145, %138, %146 : vector<32x128xi1>, vector<32x128xf32>
    %c6 = arith.constant 6 : index
    %c0_40 = arith.constant 0 : index
    %148 = vector.load %arg5[%c6, %c0_40] : memref<31x128xf32, #tpu.memory_space<vmem>>, vector<1x128xf32>
    %149 = vector.broadcast %148 : vector<1x128xf32> to vector<32x128xf32>
    %150 = arith.mulf %147, %149 : vector<32x128xf32>
    %151 = arith.addf %137, %150 : vector<32x128xf32>
    %c8_i32 = arith.constant 8 : i32
    %152 = tpu.dynamic_rotate %35 by %c8_i32 dim 0 : vector<32x128xf32>, i32 -> vector<32x128xf32>
    %c8_i32_41 = arith.constant 8 : i32
    %153 = vector.broadcast %c8_i32_41 : i32 to vector<32x1xi32>
    %154 = arith.cmpi sge, %52, %153 : vector<32x1xi32>
    %c24_i32 = arith.constant 24 : i32
    %155 = vector.broadcast %c24_i32 : i32 to vector<32x1xi32>
    %156 = arith.cmpi slt, %52, %155 : vector<32x1xi32>
    %157 = arith.andi %154, %156 : vector<32x1xi1>
    %cst_42 = arith.constant 0.000000e+00 : f32
    %158 = vector.shape_cast %157 : vector<32x1xi1> to vector<32x1xi1>
    %159 = vector.broadcast %158 : vector<32x1xi1> to vector<32x128xi1>
    %160 = vector.broadcast %cst_42 : f32 to vector<32x128xf32>
    %161 = arith.select %159, %152, %160 : vector<32x128xi1>, vector<32x128xf32>
    %c7 = arith.constant 7 : index
    %c0_43 = arith.constant 0 : index
    %162 = vector.load %arg5[%c7, %c0_43] : memref<31x128xf32, #tpu.memory_space<vmem>>, vector<1x128xf32>
    %163 = vector.broadcast %162 : vector<1x128xf32> to vector<32x128xf32>
    %164 = arith.mulf %161, %163 : vector<32x128xf32>
    %165 = arith.addf %151, %164 : vector<32x128xf32>
    %c7_i32 = arith.constant 7 : i32
    %166 = tpu.dynamic_rotate %35 by %c7_i32 dim 0 : vector<32x128xf32>, i32 -> vector<32x128xf32>
    %c7_i32_44 = arith.constant 7 : i32
    %167 = vector.broadcast %c7_i32_44 : i32 to vector<32x1xi32>
    %168 = arith.cmpi sge, %52, %167 : vector<32x1xi32>
    %c23_i32 = arith.constant 23 : i32
    %169 = vector.broadcast %c23_i32 : i32 to vector<32x1xi32>
    %170 = arith.cmpi slt, %52, %169 : vector<32x1xi32>
    %171 = arith.andi %168, %170 : vector<32x1xi1>
    %cst_45 = arith.constant 0.000000e+00 : f32
    %172 = vector.shape_cast %171 : vector<32x1xi1> to vector<32x1xi1>
    %173 = vector.broadcast %172 : vector<32x1xi1> to vector<32x128xi1>
    %174 = vector.broadcast %cst_45 : f32 to vector<32x128xf32>
    %175 = arith.select %173, %166, %174 : vector<32x128xi1>, vector<32x128xf32>
    %c8 = arith.constant 8 : index
    %c0_46 = arith.constant 0 : index
    %176 = vector.load %arg5[%c8, %c0_46] : memref<31x128xf32, #tpu.memory_space<vmem>>, vector<1x128xf32>
    %177 = vector.broadcast %176 : vector<1x128xf32> to vector<32x128xf32>
    %178 = arith.mulf %175, %177 : vector<32x128xf32>
    %179 = arith.addf %165, %178 : vector<32x128xf32>
    %c6_i32 = arith.constant 6 : i32
    %180 = tpu.dynamic_rotate %35 by %c6_i32 dim 0 : vector<32x128xf32>, i32 -> vector<32x128xf32>
    %c6_i32_47 = arith.constant 6 : i32
    %181 = vector.broadcast %c6_i32_47 : i32 to vector<32x1xi32>
    %182 = arith.cmpi sge, %52, %181 : vector<32x1xi32>
    %c22_i32 = arith.constant 22 : i32
    %183 = vector.broadcast %c22_i32 : i32 to vector<32x1xi32>
    %184 = arith.cmpi slt, %52, %183 : vector<32x1xi32>
    %185 = arith.andi %182, %184 : vector<32x1xi1>
    %cst_48 = arith.constant 0.000000e+00 : f32
    %186 = vector.shape_cast %185 : vector<32x1xi1> to vector<32x1xi1>
    %187 = vector.broadcast %186 : vector<32x1xi1> to vector<32x128xi1>
    %188 = vector.broadcast %cst_48 : f32 to vector<32x128xf32>
    %189 = arith.select %187, %180, %188 : vector<32x128xi1>, vector<32x128xf32>
    %c9 = arith.constant 9 : index
    %c0_49 = arith.constant 0 : index
    %190 = vector.load %arg5[%c9, %c0_49] : memref<31x128xf32, #tpu.memory_space<vmem>>, vector<1x128xf32>
    %191 = vector.broadcast %190 : vector<1x128xf32> to vector<32x128xf32>
    %192 = arith.mulf %189, %191 : vector<32x128xf32>
    %193 = arith.addf %179, %192 : vector<32x128xf32>
    %c5_i32 = arith.constant 5 : i32
    %194 = tpu.dynamic_rotate %35 by %c5_i32 dim 0 : vector<32x128xf32>, i32 -> vector<32x128xf32>
    %c5_i32_50 = arith.constant 5 : i32
    %195 = vector.broadcast %c5_i32_50 : i32 to vector<32x1xi32>
    %196 = arith.cmpi sge, %52, %195 : vector<32x1xi32>
    %c21_i32 = arith.constant 21 : i32
    %197 = vector.broadcast %c21_i32 : i32 to vector<32x1xi32>
    %198 = arith.cmpi slt, %52, %197 : vector<32x1xi32>
    %199 = arith.andi %196, %198 : vector<32x1xi1>
    %cst_51 = arith.constant 0.000000e+00 : f32
    %200 = vector.shape_cast %199 : vector<32x1xi1> to vector<32x1xi1>
    %201 = vector.broadcast %200 : vector<32x1xi1> to vector<32x128xi1>
    %202 = vector.broadcast %cst_51 : f32 to vector<32x128xf32>
    %203 = arith.select %201, %194, %202 : vector<32x128xi1>, vector<32x128xf32>
    %c10 = arith.constant 10 : index
    %c0_52 = arith.constant 0 : index
    %204 = vector.load %arg5[%c10, %c0_52] : memref<31x128xf32, #tpu.memory_space<vmem>>, vector<1x128xf32>
    %205 = vector.broadcast %204 : vector<1x128xf32> to vector<32x128xf32>
    %206 = arith.mulf %203, %205 : vector<32x128xf32>
    %207 = arith.addf %193, %206 : vector<32x128xf32>
    %c4_i32 = arith.constant 4 : i32
    %208 = tpu.dynamic_rotate %35 by %c4_i32 dim 0 : vector<32x128xf32>, i32 -> vector<32x128xf32>
    %c4_i32_53 = arith.constant 4 : i32
    %209 = vector.broadcast %c4_i32_53 : i32 to vector<32x1xi32>
    %210 = arith.cmpi sge, %52, %209 : vector<32x1xi32>
    %c20_i32 = arith.constant 20 : i32
    %211 = vector.broadcast %c20_i32 : i32 to vector<32x1xi32>
    %212 = arith.cmpi slt, %52, %211 : vector<32x1xi32>
    %213 = arith.andi %210, %212 : vector<32x1xi1>
    %cst_54 = arith.constant 0.000000e+00 : f32
    %214 = vector.shape_cast %213 : vector<32x1xi1> to vector<32x1xi1>
    %215 = vector.broadcast %214 : vector<32x1xi1> to vector<32x128xi1>
    %216 = vector.broadcast %cst_54 : f32 to vector<32x128xf32>
    %217 = arith.select %215, %208, %216 : vector<32x128xi1>, vector<32x128xf32>
    %c11 = arith.constant 11 : index
    %c0_55 = arith.constant 0 : index
    %218 = vector.load %arg5[%c11, %c0_55] : memref<31x128xf32, #tpu.memory_space<vmem>>, vector<1x128xf32>
    %219 = vector.broadcast %218 : vector<1x128xf32> to vector<32x128xf32>
    %220 = arith.mulf %217, %219 : vector<32x128xf32>
    %221 = arith.addf %207, %220 : vector<32x128xf32>
    %c3_i32 = arith.constant 3 : i32
    %222 = tpu.dynamic_rotate %35 by %c3_i32 dim 0 : vector<32x128xf32>, i32 -> vector<32x128xf32>
    %c3_i32_56 = arith.constant 3 : i32
    %223 = vector.broadcast %c3_i32_56 : i32 to vector<32x1xi32>
    %224 = arith.cmpi sge, %52, %223 : vector<32x1xi32>
    %c19_i32 = arith.constant 19 : i32
    %225 = vector.broadcast %c19_i32 : i32 to vector<32x1xi32>
    %226 = arith.cmpi slt, %52, %225 : vector<32x1xi32>
    %227 = arith.andi %224, %226 : vector<32x1xi1>
    %cst_57 = arith.constant 0.000000e+00 : f32
    %228 = vector.shape_cast %227 : vector<32x1xi1> to vector<32x1xi1>
    %229 = vector.broadcast %228 : vector<32x1xi1> to vector<32x128xi1>
    %230 = vector.broadcast %cst_57 : f32 to vector<32x128xf32>
    %231 = arith.select %229, %222, %230 : vector<32x128xi1>, vector<32x128xf32>
    %c12 = arith.constant 12 : index
    %c0_58 = arith.constant 0 : index
    %232 = vector.load %arg5[%c12, %c0_58] : memref<31x128xf32, #tpu.memory_space<vmem>>, vector<1x128xf32>
    %233 = vector.broadcast %232 : vector<1x128xf32> to vector<32x128xf32>
    %234 = arith.mulf %231, %233 : vector<32x128xf32>
    %235 = arith.addf %221, %234 : vector<32x128xf32>
    %c2_i32 = arith.constant 2 : i32
    %236 = tpu.dynamic_rotate %35 by %c2_i32 dim 0 : vector<32x128xf32>, i32 -> vector<32x128xf32>
    %c2_i32_59 = arith.constant 2 : i32
    %237 = vector.broadcast %c2_i32_59 : i32 to vector<32x1xi32>
    %238 = arith.cmpi sge, %52, %237 : vector<32x1xi32>
    %c18_i32 = arith.constant 18 : i32
    %239 = vector.broadcast %c18_i32 : i32 to vector<32x1xi32>
    %240 = arith.cmpi slt, %52, %239 : vector<32x1xi32>
    %241 = arith.andi %238, %240 : vector<32x1xi1>
    %cst_60 = arith.constant 0.000000e+00 : f32
    %242 = vector.shape_cast %241 : vector<32x1xi1> to vector<32x1xi1>
    %243 = vector.broadcast %242 : vector<32x1xi1> to vector<32x128xi1>
    %244 = vector.broadcast %cst_60 : f32 to vector<32x128xf32>
    %245 = arith.select %243, %236, %244 : vector<32x128xi1>, vector<32x128xf32>
    %c13 = arith.constant 13 : index
    %c0_61 = arith.constant 0 : index
    %246 = vector.load %arg5[%c13, %c0_61] : memref<31x128xf32, #tpu.memory_space<vmem>>, vector<1x128xf32>
    %247 = vector.broadcast %246 : vector<1x128xf32> to vector<32x128xf32>
    %248 = arith.mulf %245, %247 : vector<32x128xf32>
    %249 = arith.addf %235, %248 : vector<32x128xf32>
    %c1_i32_62 = arith.constant 1 : i32
    %250 = tpu.dynamic_rotate %35 by %c1_i32_62 dim 0 : vector<32x128xf32>, i32 -> vector<32x128xf32>
    %c1_i32_63 = arith.constant 1 : i32
    %251 = vector.broadcast %c1_i32_63 : i32 to vector<32x1xi32>
    %252 = arith.cmpi sge, %52, %251 : vector<32x1xi32>
    %c17_i32 = arith.constant 17 : i32
    %253 = vector.broadcast %c17_i32 : i32 to vector<32x1xi32>
    %254 = arith.cmpi slt, %52, %253 : vector<32x1xi32>
    %255 = arith.andi %252, %254 : vector<32x1xi1>
    %cst_64 = arith.constant 0.000000e+00 : f32
    %256 = vector.shape_cast %255 : vector<32x1xi1> to vector<32x1xi1>
    %257 = vector.broadcast %256 : vector<32x1xi1> to vector<32x128xi1>
    %258 = vector.broadcast %cst_64 : f32 to vector<32x128xf32>
    %259 = arith.select %257, %250, %258 : vector<32x128xi1>, vector<32x128xf32>
    %c14 = arith.constant 14 : index
    %c0_65 = arith.constant 0 : index
    %260 = vector.load %arg5[%c14, %c0_65] : memref<31x128xf32, #tpu.memory_space<vmem>>, vector<1x128xf32>
    %261 = vector.broadcast %260 : vector<1x128xf32> to vector<32x128xf32>
    %262 = arith.mulf %259, %261 : vector<32x128xf32>
    %263 = arith.addf %249, %262 : vector<32x128xf32>
    %c15 = arith.constant 15 : index
    %c0_66 = arith.constant 0 : index
    %264 = vector.load %arg5[%c15, %c0_66] : memref<31x128xf32, #tpu.memory_space<vmem>>, vector<1x128xf32>
    %265 = vector.broadcast %264 : vector<1x128xf32> to vector<32x128xf32>
    %266 = arith.mulf %35, %265 : vector<32x128xf32>
    %267 = arith.addf %263, %266 : vector<32x128xf32>
    %c31_i32_67 = arith.constant 31 : i32
    %268 = tpu.dynamic_rotate %35 by %c31_i32_67 dim 0 : vector<32x128xf32>, i32 -> vector<32x128xf32>
    %c-1_i32 = arith.constant -1 : i32
    %269 = vector.broadcast %c-1_i32 : i32 to vector<32x1xi32>
    %270 = arith.cmpi sge, %52, %269 : vector<32x1xi32>
    %c15_i32_68 = arith.constant 15 : i32
    %271 = vector.broadcast %c15_i32_68 : i32 to vector<32x1xi32>
    %272 = arith.cmpi slt, %52, %271 : vector<32x1xi32>
    %273 = arith.andi %270, %272 : vector<32x1xi1>
    %cst_69 = arith.constant 0.000000e+00 : f32
    %274 = vector.shape_cast %273 : vector<32x1xi1> to vector<32x1xi1>
    %275 = vector.broadcast %274 : vector<32x1xi1> to vector<32x128xi1>
    %276 = vector.broadcast %cst_69 : f32 to vector<32x128xf32>
    %277 = arith.select %275, %268, %276 : vector<32x128xi1>, vector<32x128xf32>
    %c16 = arith.constant 16 : index
    %c0_70 = arith.constant 0 : index
    %278 = vector.load %arg5[%c16, %c0_70] : memref<31x128xf32, #tpu.memory_space<vmem>>, vector<1x128xf32>
    %279 = vector.broadcast %278 : vector<1x128xf32> to vector<32x128xf32>
    %280 = arith.mulf %277, %279 : vector<32x128xf32>
    %281 = arith.addf %267, %280 : vector<32x128xf32>
    %c30_i32_71 = arith.constant 30 : i32
    %282 = tpu.dynamic_rotate %35 by %c30_i32_71 dim 0 : vector<32x128xf32>, i32 -> vector<32x128xf32>
    %c-2_i32 = arith.constant -2 : i32
    %283 = vector.broadcast %c-2_i32 : i32 to vector<32x1xi32>
    %284 = arith.cmpi sge, %52, %283 : vector<32x1xi32>
    %c14_i32_72 = arith.constant 14 : i32
    %285 = vector.broadcast %c14_i32_72 : i32 to vector<32x1xi32>
    %286 = arith.cmpi slt, %52, %285 : vector<32x1xi32>
    %287 = arith.andi %284, %286 : vector<32x1xi1>
    %cst_73 = arith.constant 0.000000e+00 : f32
    %288 = vector.shape_cast %287 : vector<32x1xi1> to vector<32x1xi1>
    %289 = vector.broadcast %288 : vector<32x1xi1> to vector<32x128xi1>
    %290 = vector.broadcast %cst_73 : f32 to vector<32x128xf32>
    %291 = arith.select %289, %282, %290 : vector<32x128xi1>, vector<32x128xf32>
    %c17 = arith.constant 17 : index
    %c0_74 = arith.constant 0 : index
    %292 = vector.load %arg5[%c17, %c0_74] : memref<31x128xf32, #tpu.memory_space<vmem>>, vector<1x128xf32>
    %293 = vector.broadcast %292 : vector<1x128xf32> to vector<32x128xf32>
    %294 = arith.mulf %291, %293 : vector<32x128xf32>
    %295 = arith.addf %281, %294 : vector<32x128xf32>
    %c29_i32_75 = arith.constant 29 : i32
    %296 = tpu.dynamic_rotate %35 by %c29_i32_75 dim 0 : vector<32x128xf32>, i32 -> vector<32x128xf32>
    %c-3_i32 = arith.constant -3 : i32
    %297 = vector.broadcast %c-3_i32 : i32 to vector<32x1xi32>
    %298 = arith.cmpi sge, %52, %297 : vector<32x1xi32>
    %c13_i32_76 = arith.constant 13 : i32
    %299 = vector.broadcast %c13_i32_76 : i32 to vector<32x1xi32>
    %300 = arith.cmpi slt, %52, %299 : vector<32x1xi32>
    %301 = arith.andi %298, %300 : vector<32x1xi1>
    %cst_77 = arith.constant 0.000000e+00 : f32
    %302 = vector.shape_cast %301 : vector<32x1xi1> to vector<32x1xi1>
    %303 = vector.broadcast %302 : vector<32x1xi1> to vector<32x128xi1>
    %304 = vector.broadcast %cst_77 : f32 to vector<32x128xf32>
    %305 = arith.select %303, %296, %304 : vector<32x128xi1>, vector<32x128xf32>
    %c18 = arith.constant 18 : index
    %c0_78 = arith.constant 0 : index
    %306 = vector.load %arg5[%c18, %c0_78] : memref<31x128xf32, #tpu.memory_space<vmem>>, vector<1x128xf32>
    %307 = vector.broadcast %306 : vector<1x128xf32> to vector<32x128xf32>
    %308 = arith.mulf %305, %307 : vector<32x128xf32>
    %309 = arith.addf %295, %308 : vector<32x128xf32>
    %c28_i32_79 = arith.constant 28 : i32
    %310 = tpu.dynamic_rotate %35 by %c28_i32_79 dim 0 : vector<32x128xf32>, i32 -> vector<32x128xf32>
    %c-4_i32 = arith.constant -4 : i32
    %311 = vector.broadcast %c-4_i32 : i32 to vector<32x1xi32>
    %312 = arith.cmpi sge, %52, %311 : vector<32x1xi32>
    %c12_i32_80 = arith.constant 12 : i32
    %313 = vector.broadcast %c12_i32_80 : i32 to vector<32x1xi32>
    %314 = arith.cmpi slt, %52, %313 : vector<32x1xi32>
    %315 = arith.andi %312, %314 : vector<32x1xi1>
    %cst_81 = arith.constant 0.000000e+00 : f32
    %316 = vector.shape_cast %315 : vector<32x1xi1> to vector<32x1xi1>
    %317 = vector.broadcast %316 : vector<32x1xi1> to vector<32x128xi1>
    %318 = vector.broadcast %cst_81 : f32 to vector<32x128xf32>
    %319 = arith.select %317, %310, %318 : vector<32x128xi1>, vector<32x128xf32>
    %c19 = arith.constant 19 : index
    %c0_82 = arith.constant 0 : index
    %320 = vector.load %arg5[%c19, %c0_82] : memref<31x128xf32, #tpu.memory_space<vmem>>, vector<1x128xf32>
    %321 = vector.broadcast %320 : vector<1x128xf32> to vector<32x128xf32>
    %322 = arith.mulf %319, %321 : vector<32x128xf32>
    %323 = arith.addf %309, %322 : vector<32x128xf32>
    %c27_i32_83 = arith.constant 27 : i32
    %324 = tpu.dynamic_rotate %35 by %c27_i32_83 dim 0 : vector<32x128xf32>, i32 -> vector<32x128xf32>
    %c-5_i32 = arith.constant -5 : i32
    %325 = vector.broadcast %c-5_i32 : i32 to vector<32x1xi32>
    %326 = arith.cmpi sge, %52, %325 : vector<32x1xi32>
    %c11_i32_84 = arith.constant 11 : i32
    %327 = vector.broadcast %c11_i32_84 : i32 to vector<32x1xi32>
    %328 = arith.cmpi slt, %52, %327 : vector<32x1xi32>
    %329 = arith.andi %326, %328 : vector<32x1xi1>
    %cst_85 = arith.constant 0.000000e+00 : f32
    %330 = vector.shape_cast %329 : vector<32x1xi1> to vector<32x1xi1>
    %331 = vector.broadcast %330 : vector<32x1xi1> to vector<32x128xi1>
    %332 = vector.broadcast %cst_85 : f32 to vector<32x128xf32>
    %333 = arith.select %331, %324, %332 : vector<32x128xi1>, vector<32x128xf32>
    %c20 = arith.constant 20 : index
    %c0_86 = arith.constant 0 : index
    %334 = vector.load %arg5[%c20, %c0_86] : memref<31x128xf32, #tpu.memory_space<vmem>>, vector<1x128xf32>
    %335 = vector.broadcast %334 : vector<1x128xf32> to vector<32x128xf32>
    %336 = arith.mulf %333, %335 : vector<32x128xf32>
    %337 = arith.addf %323, %336 : vector<32x128xf32>
    %c26_i32_87 = arith.constant 26 : i32
    %338 = tpu.dynamic_rotate %35 by %c26_i32_87 dim 0 : vector<32x128xf32>, i32 -> vector<32x128xf32>
    %c-6_i32 = arith.constant -6 : i32
    %339 = vector.broadcast %c-6_i32 : i32 to vector<32x1xi32>
    %340 = arith.cmpi sge, %52, %339 : vector<32x1xi32>
    %c10_i32_88 = arith.constant 10 : i32
    %341 = vector.broadcast %c10_i32_88 : i32 to vector<32x1xi32>
    %342 = arith.cmpi slt, %52, %341 : vector<32x1xi32>
    %343 = arith.andi %340, %342 : vector<32x1xi1>
    %cst_89 = arith.constant 0.000000e+00 : f32
    %344 = vector.shape_cast %343 : vector<32x1xi1> to vector<32x1xi1>
    %345 = vector.broadcast %344 : vector<32x1xi1> to vector<32x128xi1>
    %346 = vector.broadcast %cst_89 : f32 to vector<32x128xf32>
    %347 = arith.select %345, %338, %346 : vector<32x128xi1>, vector<32x128xf32>
    %c21 = arith.constant 21 : index
    %c0_90 = arith.constant 0 : index
    %348 = vector.load %arg5[%c21, %c0_90] : memref<31x128xf32, #tpu.memory_space<vmem>>, vector<1x128xf32>
    %349 = vector.broadcast %348 : vector<1x128xf32> to vector<32x128xf32>
    %350 = arith.mulf %347, %349 : vector<32x128xf32>
    %351 = arith.addf %337, %350 : vector<32x128xf32>
    %c25_i32_91 = arith.constant 25 : i32
    %352 = tpu.dynamic_rotate %35 by %c25_i32_91 dim 0 : vector<32x128xf32>, i32 -> vector<32x128xf32>
    %c-7_i32 = arith.constant -7 : i32
    %353 = vector.broadcast %c-7_i32 : i32 to vector<32x1xi32>
    %354 = arith.cmpi sge, %52, %353 : vector<32x1xi32>
    %c9_i32_92 = arith.constant 9 : i32
    %355 = vector.broadcast %c9_i32_92 : i32 to vector<32x1xi32>
    %356 = arith.cmpi slt, %52, %355 : vector<32x1xi32>
    %357 = arith.andi %354, %356 : vector<32x1xi1>
    %cst_93 = arith.constant 0.000000e+00 : f32
    %358 = vector.shape_cast %357 : vector<32x1xi1> to vector<32x1xi1>
    %359 = vector.broadcast %358 : vector<32x1xi1> to vector<32x128xi1>
    %360 = vector.broadcast %cst_93 : f32 to vector<32x128xf32>
    %361 = arith.select %359, %352, %360 : vector<32x128xi1>, vector<32x128xf32>
    %c22 = arith.constant 22 : index
    %c0_94 = arith.constant 0 : index
    %362 = vector.load %arg5[%c22, %c0_94] : memref<31x128xf32, #tpu.memory_space<vmem>>, vector<1x128xf32>
    %363 = vector.broadcast %362 : vector<1x128xf32> to vector<32x128xf32>
    %364 = arith.mulf %361, %363 : vector<32x128xf32>
    %365 = arith.addf %351, %364 : vector<32x128xf32>
    %c24_i32_95 = arith.constant 24 : i32
    %366 = tpu.dynamic_rotate %35 by %c24_i32_95 dim 0 : vector<32x128xf32>, i32 -> vector<32x128xf32>
    %c-8_i32 = arith.constant -8 : i32
    %367 = vector.broadcast %c-8_i32 : i32 to vector<32x1xi32>
    %368 = arith.cmpi sge, %52, %367 : vector<32x1xi32>
    %c8_i32_96 = arith.constant 8 : i32
    %369 = vector.broadcast %c8_i32_96 : i32 to vector<32x1xi32>
    %370 = arith.cmpi slt, %52, %369 : vector<32x1xi32>
    %371 = arith.andi %368, %370 : vector<32x1xi1>
    %cst_97 = arith.constant 0.000000e+00 : f32
    %372 = vector.shape_cast %371 : vector<32x1xi1> to vector<32x1xi1>
    %373 = vector.broadcast %372 : vector<32x1xi1> to vector<32x128xi1>
    %374 = vector.broadcast %cst_97 : f32 to vector<32x128xf32>
    %375 = arith.select %373, %366, %374 : vector<32x128xi1>, vector<32x128xf32>
    %c23 = arith.constant 23 : index
    %c0_98 = arith.constant 0 : index
    %376 = vector.load %arg5[%c23, %c0_98] : memref<31x128xf32, #tpu.memory_space<vmem>>, vector<1x128xf32>
    %377 = vector.broadcast %376 : vector<1x128xf32> to vector<32x128xf32>
    %378 = arith.mulf %375, %377 : vector<32x128xf32>
    %379 = arith.addf %365, %378 : vector<32x128xf32>
    %c23_i32_99 = arith.constant 23 : i32
    %380 = tpu.dynamic_rotate %35 by %c23_i32_99 dim 0 : vector<32x128xf32>, i32 -> vector<32x128xf32>
    %c-9_i32 = arith.constant -9 : i32
    %381 = vector.broadcast %c-9_i32 : i32 to vector<32x1xi32>
    %382 = arith.cmpi sge, %52, %381 : vector<32x1xi32>
    %c7_i32_100 = arith.constant 7 : i32
    %383 = vector.broadcast %c7_i32_100 : i32 to vector<32x1xi32>
    %384 = arith.cmpi slt, %52, %383 : vector<32x1xi32>
    %385 = arith.andi %382, %384 : vector<32x1xi1>
    %cst_101 = arith.constant 0.000000e+00 : f32
    %386 = vector.shape_cast %385 : vector<32x1xi1> to vector<32x1xi1>
    %387 = vector.broadcast %386 : vector<32x1xi1> to vector<32x128xi1>
    %388 = vector.broadcast %cst_101 : f32 to vector<32x128xf32>
    %389 = arith.select %387, %380, %388 : vector<32x128xi1>, vector<32x128xf32>
    %c24 = arith.constant 24 : index
    %c0_102 = arith.constant 0 : index
    %390 = vector.load %arg5[%c24, %c0_102] : memref<31x128xf32, #tpu.memory_space<vmem>>, vector<1x128xf32>
    %391 = vector.broadcast %390 : vector<1x128xf32> to vector<32x128xf32>
    %392 = arith.mulf %389, %391 : vector<32x128xf32>
    %393 = arith.addf %379, %392 : vector<32x128xf32>
    %c22_i32_103 = arith.constant 22 : i32
    %394 = tpu.dynamic_rotate %35 by %c22_i32_103 dim 0 : vector<32x128xf32>, i32 -> vector<32x128xf32>
    %c-10_i32 = arith.constant -10 : i32
    %395 = vector.broadcast %c-10_i32 : i32 to vector<32x1xi32>
    %396 = arith.cmpi sge, %52, %395 : vector<32x1xi32>
    %c6_i32_104 = arith.constant 6 : i32
    %397 = vector.broadcast %c6_i32_104 : i32 to vector<32x1xi32>
    %398 = arith.cmpi slt, %52, %397 : vector<32x1xi32>
    %399 = arith.andi %396, %398 : vector<32x1xi1>
    %cst_105 = arith.constant 0.000000e+00 : f32
    %400 = vector.shape_cast %399 : vector<32x1xi1> to vector<32x1xi1>
    %401 = vector.broadcast %400 : vector<32x1xi1> to vector<32x128xi1>
    %402 = vector.broadcast %cst_105 : f32 to vector<32x128xf32>
    %403 = arith.select %401, %394, %402 : vector<32x128xi1>, vector<32x128xf32>
    %c25 = arith.constant 25 : index
    %c0_106 = arith.constant 0 : index
    %404 = vector.load %arg5[%c25, %c0_106] : memref<31x128xf32, #tpu.memory_space<vmem>>, vector<1x128xf32>
    %405 = vector.broadcast %404 : vector<1x128xf32> to vector<32x128xf32>
    %406 = arith.mulf %403, %405 : vector<32x128xf32>
    %407 = arith.addf %393, %406 : vector<32x128xf32>
    %c21_i32_107 = arith.constant 21 : i32
    %408 = tpu.dynamic_rotate %35 by %c21_i32_107 dim 0 : vector<32x128xf32>, i32 -> vector<32x128xf32>
    %c-11_i32 = arith.constant -11 : i32
    %409 = vector.broadcast %c-11_i32 : i32 to vector<32x1xi32>
    %410 = arith.cmpi sge, %52, %409 : vector<32x1xi32>
    %c5_i32_108 = arith.constant 5 : i32
    %411 = vector.broadcast %c5_i32_108 : i32 to vector<32x1xi32>
    %412 = arith.cmpi slt, %52, %411 : vector<32x1xi32>
    %413 = arith.andi %410, %412 : vector<32x1xi1>
    %cst_109 = arith.constant 0.000000e+00 : f32
    %414 = vector.shape_cast %413 : vector<32x1xi1> to vector<32x1xi1>
    %415 = vector.broadcast %414 : vector<32x1xi1> to vector<32x128xi1>
    %416 = vector.broadcast %cst_109 : f32 to vector<32x128xf32>
    %417 = arith.select %415, %408, %416 : vector<32x128xi1>, vector<32x128xf32>
    %c26 = arith.constant 26 : index
    %c0_110 = arith.constant 0 : index
    %418 = vector.load %arg5[%c26, %c0_110] : memref<31x128xf32, #tpu.memory_space<vmem>>, vector<1x128xf32>
    %419 = vector.broadcast %418 : vector<1x128xf32> to vector<32x128xf32>
    %420 = arith.mulf %417, %419 : vector<32x128xf32>
    %421 = arith.addf %407, %420 : vector<32x128xf32>
    %c20_i32_111 = arith.constant 20 : i32
    %422 = tpu.dynamic_rotate %35 by %c20_i32_111 dim 0 : vector<32x128xf32>, i32 -> vector<32x128xf32>
    %c-12_i32 = arith.constant -12 : i32
    %423 = vector.broadcast %c-12_i32 : i32 to vector<32x1xi32>
    %424 = arith.cmpi sge, %52, %423 : vector<32x1xi32>
    %c4_i32_112 = arith.constant 4 : i32
    %425 = vector.broadcast %c4_i32_112 : i32 to vector<32x1xi32>
    %426 = arith.cmpi slt, %52, %425 : vector<32x1xi32>
    %427 = arith.andi %424, %426 : vector<32x1xi1>
    %cst_113 = arith.constant 0.000000e+00 : f32
    %428 = vector.shape_cast %427 : vector<32x1xi1> to vector<32x1xi1>
    %429 = vector.broadcast %428 : vector<32x1xi1> to vector<32x128xi1>
    %430 = vector.broadcast %cst_113 : f32 to vector<32x128xf32>
    %431 = arith.select %429, %422, %430 : vector<32x128xi1>, vector<32x128xf32>
    %c27 = arith.constant 27 : index
    %c0_114 = arith.constant 0 : index
    %432 = vector.load %arg5[%c27, %c0_114] : memref<31x128xf32, #tpu.memory_space<vmem>>, vector<1x128xf32>
    %433 = vector.broadcast %432 : vector<1x128xf32> to vector<32x128xf32>
    %434 = arith.mulf %431, %433 : vector<32x128xf32>
    %435 = arith.addf %421, %434 : vector<32x128xf32>
    %c19_i32_115 = arith.constant 19 : i32
    %436 = tpu.dynamic_rotate %35 by %c19_i32_115 dim 0 : vector<32x128xf32>, i32 -> vector<32x128xf32>
    %c-13_i32 = arith.constant -13 : i32
    %437 = vector.broadcast %c-13_i32 : i32 to vector<32x1xi32>
    %438 = arith.cmpi sge, %52, %437 : vector<32x1xi32>
    %c3_i32_116 = arith.constant 3 : i32
    %439 = vector.broadcast %c3_i32_116 : i32 to vector<32x1xi32>
    %440 = arith.cmpi slt, %52, %439 : vector<32x1xi32>
    %441 = arith.andi %438, %440 : vector<32x1xi1>
    %cst_117 = arith.constant 0.000000e+00 : f32
    %442 = vector.shape_cast %441 : vector<32x1xi1> to vector<32x1xi1>
    %443 = vector.broadcast %442 : vector<32x1xi1> to vector<32x128xi1>
    %444 = vector.broadcast %cst_117 : f32 to vector<32x128xf32>
    %445 = arith.select %443, %436, %444 : vector<32x128xi1>, vector<32x128xf32>
    %c28 = arith.constant 28 : index
    %c0_118 = arith.constant 0 : index
    %446 = vector.load %arg5[%c28, %c0_118] : memref<31x128xf32, #tpu.memory_space<vmem>>, vector<1x128xf32>
    %447 = vector.broadcast %446 : vector<1x128xf32> to vector<32x128xf32>
    %448 = arith.mulf %445, %447 : vector<32x128xf32>
    %449 = arith.addf %435, %448 : vector<32x128xf32>
    %c18_i32_119 = arith.constant 18 : i32
    %450 = tpu.dynamic_rotate %35 by %c18_i32_119 dim 0 : vector<32x128xf32>, i32 -> vector<32x128xf32>
    %c-14_i32 = arith.constant -14 : i32
    %451 = vector.broadcast %c-14_i32 : i32 to vector<32x1xi32>
    %452 = arith.cmpi sge, %52, %451 : vector<32x1xi32>
    %c2_i32_120 = arith.constant 2 : i32
    %453 = vector.broadcast %c2_i32_120 : i32 to vector<32x1xi32>
    %454 = arith.cmpi slt, %52, %453 : vector<32x1xi32>
    %455 = arith.andi %452, %454 : vector<32x1xi1>
    %cst_121 = arith.constant 0.000000e+00 : f32
    %456 = vector.shape_cast %455 : vector<32x1xi1> to vector<32x1xi1>
    %457 = vector.broadcast %456 : vector<32x1xi1> to vector<32x128xi1>
    %458 = vector.broadcast %cst_121 : f32 to vector<32x128xf32>
    %459 = arith.select %457, %450, %458 : vector<32x128xi1>, vector<32x128xf32>
    %c29 = arith.constant 29 : index
    %c0_122 = arith.constant 0 : index
    %460 = vector.load %arg5[%c29, %c0_122] : memref<31x128xf32, #tpu.memory_space<vmem>>, vector<1x128xf32>
    %461 = vector.broadcast %460 : vector<1x128xf32> to vector<32x128xf32>
    %462 = arith.mulf %459, %461 : vector<32x128xf32>
    %463 = arith.addf %449, %462 : vector<32x128xf32>
    %c17_i32_123 = arith.constant 17 : i32
    %464 = tpu.dynamic_rotate %35 by %c17_i32_123 dim 0 : vector<32x128xf32>, i32 -> vector<32x128xf32>
    %c-15_i32 = arith.constant -15 : i32
    %465 = vector.broadcast %c-15_i32 : i32 to vector<32x1xi32>
    %466 = arith.cmpi sge, %52, %465 : vector<32x1xi32>
    %c1_i32_124 = arith.constant 1 : i32
    %467 = vector.broadcast %c1_i32_124 : i32 to vector<32x1xi32>
    %468 = arith.cmpi slt, %52, %467 : vector<32x1xi32>
    %469 = arith.andi %466, %468 : vector<32x1xi1>
    %cst_125 = arith.constant 0.000000e+00 : f32
    %470 = vector.shape_cast %469 : vector<32x1xi1> to vector<32x1xi1>
    %471 = vector.broadcast %470 : vector<32x1xi1> to vector<32x128xi1>
    %472 = vector.broadcast %cst_125 : f32 to vector<32x128xf32>
    %473 = arith.select %471, %464, %472 : vector<32x128xi1>, vector<32x128xf32>
    %c30 = arith.constant 30 : index
    %c0_126 = arith.constant 0 : index
    %474 = vector.load %arg5[%c30, %c0_126] : memref<31x128xf32, #tpu.memory_space<vmem>>, vector<1x128xf32>
    %475 = vector.broadcast %474 : vector<1x128xf32> to vector<32x128xf32>
    %476 = arith.mulf %473, %475 : vector<32x128xf32>
    %477 = arith.addf %463, %476 : vector<32x128xf32>
    %c0_127 = arith.constant 0 : index
    %c0_128 = arith.constant 0 : index
    %478 = vector.load %arg6[%c0_127, %c0_128] : memref<1x128xf32, #tpu.memory_space<vmem>>, vector<1x128xf32>
    %479 = vector.broadcast %478 : vector<1x128xf32> to vector<32x128xf32>
    %480 = arith.addf %477, %479 : vector<32x128xf32>
    %cst_129 = arith.constant dense<0.000000e+00> : vector<128xf32>
    %481 = vector.multi_reduction <add>, %480, %cst_129 [0] : vector<32x128xf32> to vector<128xf32>
    %482 = vector.shape_cast %481 : vector<128xf32> to vector<1x128xf32>
    %cst_130 = arith.constant 3.200000e+01 : f32
    %483 = vector.broadcast %cst_130 : f32 to vector<1x128xf32>
    %484 = arith.divf %482, %483 : vector<1x128xf32>
    %485 = vector.broadcast %484 : vector<1x128xf32> to vector<32x128xf32>
    %486 = arith.subf %480, %485 : vector<32x128xf32>
    %487 = arith.mulf %486, %486 : vector<32x128xf32>
    %cst_131 = arith.constant dense<0.000000e+00> : vector<128xf32>
    %488 = vector.multi_reduction <add>, %487, %cst_131 [0] : vector<32x128xf32> to vector<128xf32>
    %489 = vector.shape_cast %488 : vector<128xf32> to vector<1x128xf32>
    %cst_132 = arith.constant 3.200000e+01 : f32
    %490 = vector.broadcast %cst_132 : f32 to vector<1x128xf32>
    %491 = arith.divf %489, %490 : vector<1x128xf32>
    %cst_133 = arith.constant 9.99999974E-6 : f32
    %492 = vector.broadcast %cst_133 : f32 to vector<1x128xf32>
    %493 = arith.addf %491, %492 : vector<1x128xf32>
    %494 = math.rsqrt %493 : vector<1x128xf32>
    %495 = vector.broadcast %494 : vector<1x128xf32> to vector<32x128xf32>
    %496 = arith.mulf %486, %495 : vector<32x128xf32>
    %c0_134 = arith.constant 0 : index
    %c0_135 = arith.constant 0 : index
    %497 = vector.load %arg7[%c0_134, %c0_135] : memref<1x128xf32, #tpu.memory_space<vmem>>, vector<1x128xf32>
    %498 = vector.broadcast %497 : vector<1x128xf32> to vector<32x128xf32>
    %499 = arith.mulf %496, %498 : vector<32x128xf32>
    %c0_136 = arith.constant 0 : index
    %c0_137 = arith.constant 0 : index
    %500 = vector.load %arg8[%c0_136, %c0_137] : memref<1x128xf32, #tpu.memory_space<vmem>>, vector<1x128xf32>
    %501 = vector.broadcast %500 : vector<1x128xf32> to vector<32x128xf32>
    %502 = arith.addf %499, %501 : vector<32x128xf32>
    %503 = arith.negf %502 : vector<32x128xf32>
    %504 = math.exp %503 : vector<32x128xf32>
    %cst_138 = arith.constant 1.000000e+00 : f32
    %505 = vector.broadcast %cst_138 : f32 to vector<32x128xf32>
    %506 = arith.addf %505, %504 : vector<32x128xf32>
    %507 = arith.divf %505, %506 : vector<32x128xf32>
    %508 = arith.mulf %502, %507 : vector<32x128xf32>
    %c0_139 = arith.constant 0 : index
    %c0_140 = arith.constant 0 : index
    %509 = vector.load %arg9[%c0_139, %c0_140] : memref<128x64xf32, #tpu.memory_space<vmem>>, vector<128x64xf32>
    %cst_141 = arith.constant dense<0.000000e+00> : vector<32x64xf32>
    %510 = tpu.matmul %508, %509, %cst_141 {dimension_numbers = #tpu.dot_dimension_numbers<[1], [0], [0], [1], [0, 0, 1, 1], [], []>} : vector<32x128xf32>, vector<128x64xf32>, vector<32x64xf32> -> vector<32x64xf32>
    %c0_142 = arith.constant 0 : index
    %c0_143 = arith.constant 0 : index
    %511 = vector.load %arg10[%c0_142, %c0_143] : memref<1x64xf32, #tpu.memory_space<vmem>>, vector<1x64xf32>
    %512 = vector.broadcast %511 : vector<1x64xf32> to vector<32x64xf32>
    %513 = arith.addf %510, %512 : vector<32x64xf32>
    %c0_144 = arith.constant 0 : index
    %c0_145 = arith.constant 0 : index
    %514 = vector.load %arg11[%c0_144, %c0_145] : memref<32x64xf32, #tpu.memory_space<vmem>>, vector<32x64xf32>
    tpu.vector_store %arg11[%c0_144, %c0_145], %513 {strides = array<i32>} : memref<32x64xf32, #tpu.memory_space<vmem>>, vector<32x64xf32>,
    return
  }
}

</mosaic_0001>

<bundles_post_ra>
// kernel: tpu_custom_call.1
= control target key start
LH: loop header
LB: loop body
LE: loop exit
PB: predicated region body
PF: predicated region fallthrough
CT: control target
= control target key end

     0   :  { %16 = vsyncpa [#allocation3], 0  ;;  %s2895_s0 = inlined_call_operand.vmem [shape: f32[32,64], index: 0, kind: input, shape index: {}]   ;;  %s2896_s1 = inlined_call_operand.hbm [shape: f32[1,64], index: 1, kind: input, shape index: {}]   ;;  %s2897_s2 = inlined_call_operand.hbm [shape: f32[1,64], index: 2, kind: input, shape index: {}]   ;;  %s2898_s3 = inlined_call_operand.vmem [shape: f32[64,256], index: 3, kind: input, shape index: {}]   ;;  %s2899_s4 = inlined_call_operand.vmem [shape: f32[1,256], index: 4, kind: input, shape index: {}]   ;;  %s2900_s5 = inlined_call_operand.vmem [shape: f32[31,128], index: 5, kind: input, shape index: {}]   ;;  %s2901_s6 = inlined_call_operand.vmem [shape: f32[1,128], index: 6, kind: input, shape index: {}]   ;;  %s2902_s7 = inlined_call_operand.vmem [shape: f32[1,128], index: 7, kind: input, shape index: {}]   ;;  %s2903_s8 = inlined_call_operand.vmem [shape: f32[1,128], index: 8, kind: input, shape index: {}]   ;;  %s2904_s9 = inlined_call_operand.vmem [shape: f32[128,64], index: 9, kind: input, shape index: {}]   ;;  %s2905_s10 = inlined_call_operand.vmem [shape: f32[1,64], index: 10, kind: input, shape index: {}]   ;;  %s2906_s11 = inlined_call_operand.hbm [shape: f32[32,64], index: 11, kind: output, shape index: {}]  }
   0x1   :  { %17 = vsyncpa [#allocation6], 0 }
   0x2   :  { %18 = vsyncpa [#allocation4], 0  ;;  %s26_s19 = sshll.u32 %s2896_s1, 4  ;;  %s1928_s20 = smov [#allocation2]   ;;  %s27_s19 = int_to_ptr.hbm [resolvable:$true] %s26_s19 }
   0x3   :  { %s28_s21 = sshll.u32 %s1928_s20, 4  ;;  %s37_s24 = sshll.u32 %s2897_s2, 4  ;;  %s29_s21 = int_to_ptr.vmem [resolvable:$true] %s28_s21  ;;  %s38_s24 = int_to_ptr.hbm [resolvable:$true] %s37_s24 }
   0x4   :  { %31 = dma.hbm_to_vmem [thread:$0]  %s27_s19, 16, %s29_s21, [#allocation3]  }
   0x5   :  { %s1929_s25 = smov [#allocation5]  }
   0x6   :  { %s39_s26 = sshll.u32 %s1929_s25, 4  ;;  %s40_s26 = int_to_ptr.vmem [resolvable:$true] %s39_s26 }
   0x7   :  { %42 = dma.hbm_to_vmem [thread:$0]  %s38_s24, 16, %s40_s26, [#allocation6]  }
   0x8   :  { %1922 = dma.done.wait [#allocation3], 16  }
   0x9   :  { %1923 = vsyncadd [#allocation3], 4294967280 }
   0xa   :  { %1924 = dma.done.wait [#allocation6], 16  }
   0xb   :  { %1925 = vsyncadd [#allocation6], 4294967280  ;;  %vm2907_vm0 = vcmask 523264   ;;  %v69_v0 = vld [vmem:[%s2895_s0 + $0x10] sm:$0xff]  ;;  %v67_v1 = vld [vmem:[%s2895_s0] sm:$0xff]  ;;  %v1930_v8 = vmov 64.0  }
   0xc   :  { %v70_v2 = vld [vmem:[%s2895_s0 + $0x18] sm:$0xff]  ;;  %v78_v3 = vsel %vm2907_vm0, %v69_v0, 0.0  ;;  %v72_v4 = vsel %vm2907_vm0, %v67_v1, 0.0  ;;  %v68_v5 = vld [vmem:[%s2895_s0 + $0x8] sm:$0xff]  ;;  %1804 = vrcp.f32 %v1930_v8  ;;  %v197_v35 = vld [vmem:[%s2898_s3 + $0x70] sm:$0xff]  ;;  %s1932_s24 = smov [#allocation7]  }
   0xd   :  { %79 = vadd.xlane.f32.xlu1 %v78_v3  ;;  %73 = vadd.xlane.f32.xlu0 %v72_v4  ;;  %v81_v6 = vsel %vm2907_vm0, %v70_v2, 0.0  ;;  %v75_v7 = vsel %vm2907_vm0, %v68_v5, 0.0  ;;  %v198_v36 = vld [vmem:[%s2898_s3 + $0x78] sm:$0xff]  ;;  %v195_v37 = vld [vmem:[%s2898_s3 + $0x60] sm:$0xff]  ;;  %v196_v38 = vld [vmem:[%s2898_s3 + $0x68] sm:$0xff]  ;;  %s1712_s25 = sshll.u32 %s1932_s24, 4  ;;  %s1713_s25 = int_to_ptr.vmem [resolvable:$true] %s1712_s25 }
   0xe   :  { %225 = vmatpush.msra.mxu0 %v197_v35  ;;  %254 = vmatpush.msra.mxu1 %v198_v36  ;;  %v193_v39 = vld [vmem:[%s2898_s3 + $0x50] sm:$0xff]  ;;  %v194_v40 = vld [vmem:[%s2898_s3 + $0x58] sm:$0xff]  ;;  %v191_v41 = vld [vmem:[%s2898_s3 + $0x40] sm:$0xff]  ;;  %s1934_s27 = smov 8  }
   0xf   :  { %v192_v42 = vld [vmem:[%s2898_s3 + $0x48] sm:$0xff]  ;;  %v189_v43 = vld [vmem:[%s2898_s3 + $0x30] sm:$0xff]  ;;  %v190_v44 = vld [vmem:[%s2898_s3 + $0x38] sm:$0xff] }
  0x10   :  { %226 = vmatpush.msra.mxu0 %v195_v37  ;;  %255 = vmatpush.msra.mxu1 %v196_v38  ;;  %v187_v45 = vld [vmem:[%s2898_s3 + $0x20] sm:$0xff]  ;;  %v188_v46 = vld [vmem:[%s2898_s3 + $0x28] sm:$0xff]  ;;  %v185_v47 = vld [vmem:[%s2898_s3 + $0x10] sm:$0xff] }
  0x11   :  { %v186_v48 = vld [vmem:[%s2898_s3 + $0x18] sm:$0xff]  ;;  %v183_v49 = vld [vmem:[%s2898_s3] sm:$0xff]  ;;  %v184_v50 = vld [vmem:[%s2898_s3 + $0x8] sm:$0xff] }
  0x12   :  { %v1805_v9 = vpop.eup %1804  ;;  %227 = vmatpush.msra.mxu0 %v193_v39  ;;  %256 = vmatpush.msra.mxu1 %v194_v40 }
  0x13   :  { %v85_v10 = vmul.f32 64.0, %v1805_v9  ;;  %vm89_vm1 = vweird.f32 %v1805_v9 }
  0x14   :  { %228 = vmatpush.msra.mxu0 %v191_v41  ;;  %257 = vmatpush.msra.mxu1 %v192_v42 }
  0x15   :  { %82 = vadd.xlane.f32.xlu1 %v81_v6  ;;  %76 = vadd.xlane.f32.xlu0 %v75_v7  ;;  %v86_v11 = vsub.f32 1.0, %v85_v10 }
  0x16   :  { %229 = vmatpush.msra.mxu0 %v189_v43  ;;  %258 = vmatpush.msra.mxu1 %v190_v44 }
  0x17   :  { %v87_v12 = vmul.f32 %v1805_v9, %v86_v11 }
  0x18   :  { %230 = vmatpush.msra.mxu0 %v187_v45  ;;  %259 = vmatpush.msra.mxu1 %v188_v46 }
  0x19   :  { %v88_v13 = vadd.f32 %v1805_v9, %v87_v12 }
  0x1a   :  { %231 = vmatpush.msra.mxu0 %v185_v47  ;;  %260 = vmatpush.msra.mxu1 %v186_v48 }
  0x1b   :  { %v2017_v14 = vsel %vm89_vm1, %v1805_v9, %v88_v13  ;;  %v1767_v13 = vld [vmem:[#allocation2] ss:$0 sm:$0xff] }
  0x1c   :  { %232 = vmatpush.msra.mxu0 %v183_v49  ;;  %261 = vmatpush.msra.mxu1 %v184_v50  ;;  %v2113_v49 = vld [vmem:[%s2900_s5] ss:$0 sm:$0xff]  ;;  %v2118_v50 = vld [vmem:[%s2900_s5 + $0x1] ss:$0 sm:$0xff] }
  0x80   :  { %v80_v15 = vpop.xlane.xlu1 %79  ;;  %v74_v16 = vpop.xlane.xlu0 %73 }
  0x81   :  { %v93_v17 = vmul.f32 %v2017_v14, %v80_v15  ;;  %v91_v18 = vmul.f32 %v2017_v14, %v74_v16 }
  0x83   :  { %v2021_v19 = vsub.f32 %v69_v0, %v93_v17  ;;  %v2023_v20 = vsub.f32 %v67_v1, %v91_v18  ;;  %v1768_v17 = vld [vmem:[#allocation5] ss:$0 sm:$0xff] }
  0x85   :  { %v101_v21 = vmul.f32 %v2021_v19, %v2021_v19  ;;  %v99_v22 = vmul.f32 %v2023_v20, %v2023_v20 }
  0x87   :  { %v109_v23 = vsel %vm2907_vm0, %v101_v21, 0.0  ;;  %v103_v24 = vsel %vm2907_vm0, %v99_v22, 0.0 }
  0x88   :  { %v83_v25 = vpop.xlane.xlu1 %82  ;;  %110 = vadd.xlane.f32.xlu0 %v109_v23  ;;  %104 = vadd.xlane.f32.xlu2 %v103_v24  ;;  %v77_v26 = vpop.xlane.xlu0 %76 }
  0x89   :  { %v94_v27 = vmul.f32 %v2017_v14, %v83_v25  ;;  %v92_v28 = vmul.f32 %v2017_v14, %v77_v26 }
  0x8b   :  { %v2033_v29 = vsub.f32 %v70_v2, %v94_v27  ;;  %v2035_v30 = vsub.f32 %v68_v5, %v92_v28 }
  0x8d   :  { %v102_v31 = vmul.f32 %v2033_v29, %v2033_v29  ;;  %v100_v32 = vmul.f32 %v2035_v30, %v2035_v30 }
  0x8f   :  { %v112_v33 = vsel %vm2907_vm0, %v102_v31, 0.0  ;;  %v106_v34 = vsel %vm2907_vm0, %v100_v32, 0.0 }
  0x90   :  { %113 = vadd.xlane.f32.xlu1 %v112_v33  ;;  %107 = vadd.xlane.f32.xlu2 %v106_v34 }
  0xfb   :  { %v105_v51 = vpop.xlane.xlu2 %104  ;;  %v111_v52 = vpop.xlane.xlu0 %110 }
  0xfc   :  { %v115_v53 = vmul.f32 %v105_v51, %v2017_v14  ;;  %v117_v54 = vmul.f32 %v111_v52, %v2017_v14 }
  0xfe   :  { %v119_v55 = vadd.f32 1e-05, %v115_v53  ;;  %v121_v56 = vadd.f32 1e-05, %v117_v54 }
 0x100   :  { %1806 = vrsqrt.f32 %v119_v55  ;;  %vm129_vm3 = vweird.f32 %v119_v55  ;;  %vm149_vm5 = vweird.f32 %v121_v56 }
 0x101   :  { %1808 = vrsqrt.f32 %v121_v56 }
 0x103   :  { %v114_v57 = vpop.xlane.xlu1 %113  ;;  %v108_v58 = vpop.xlane.xlu2 %107 }
 0x104   :  { %v118_v59 = vmul.f32 %v114_v57, %v2017_v14  ;;  %v116_v60 = vmul.f32 %v108_v58, %v2017_v14  ;;  %v2127_v57 = vld [vmem:[%s2900_s5 + $0x2] ss:$0 sm:$0xff] }
 0x106   :  { %v1807_v61 = vpop.eup %1806  ;;  %v122_v62 = vadd.f32 1e-05, %v118_v59  ;;  %v120_v63 = vadd.f32 1e-05, %v116_v60 }
 0x107   :  { %v1809_v0 = vpop.eup %1808  ;;  %v124_v1 = vmul.f32 %v1807_v61, %v119_v55  ;;  %vm130_vm2 = vweird.f32 %v1807_v61  ;;  %v443_v55 = vmul.f32 0.0, %v2113_v49 }
 0x108   :  { %v144_v2 = vmul.f32 %v1809_v0, %v121_v56  ;;  %1810 = vrsqrt.f32 %v122_v62  ;;  %vm131_vm4 = vmor %vm129_vm3, %vm130_vm2  ;;  %vm150_vm6 = vweird.f32 %v1809_v0  ;;  %vm139_vm9 = vweird.f32 %v120_v63 }
 0x109   :  { %v125_v3 = vmul.f32 %v1807_v61, %v124_v1  ;;  %1812 = vrsqrt.f32 %v120_v63  ;;  %vm151_vm8 = vmor %vm149_vm5, %vm150_vm6  ;;  %vm159_vm11 = vweird.f32 %v122_v62  ;;  %v486_v56 = vmul.f32 0.0, %v2118_v50 }
 0x10a   :  { %v145_v5 = vmul.f32 %v1809_v0, %v144_v2 }
 0x10b   :  { %v126_v4 = vmul.f32 0.5, %v125_v3  ;;  %v490_v60 = vadd.f32 %v486_v56, %v443_v55  ;;  %v1664_v56 = vld [vmem:[%s2904_s9 + $0x48] sm:$0xff] }
 0x10c   :  { %v146_v10 = vmul.f32 0.5, %v145_v5 }
 0x10d   :  { %v127_v6 = vsub.f32 1.5, %v126_v4 }
 0x10e   :  { %v1811_v7 = vpop.eup %1810  ;;  %v147_v18 = vsub.f32 1.5, %v146_v10 }
 0x10f   :  { %v1813_v8 = vpop.eup %1812  ;;  %v128_v9 = vmul.f32 %v1807_v61, %v127_v6  ;;  %v154_v11 = vmul.f32 %v1811_v7, %v122_v62  ;;  %vm160_vm12 = vweird.f32 %v1811_v7  ;;  %v2133_v62 = vld [vmem:[%s2900_s5 + $0x3] ss:$0 sm:$0xff]  ;;  %v2141_v6 = vld [vmem:[%s2900_s5 + $0x4] ss:$0 sm:$0xff] }
 0x110   :  { %v134_v12 = vmul.f32 %v1813_v8, %v120_v63  ;;  %vm140_vm7 = vweird.f32 %v1813_v8  ;;  %v148_v26 = vmul.f32 %v1809_v0, %v147_v18  ;;  %vm161_vm13 = vmor %vm159_vm11, %vm160_vm12  ;;  %v572_v5 = vmul.f32 0.0, %v2133_v62  ;;  %v1668_v18 = vld [vmem:[%s2904_s9 + $0x68] sm:$0xff] }
 0x111   :  { %v132_v14 = vsel %vm131_vm4, %v1807_v61, %v128_v9  ;;  %v155_v21 = vmul.f32 %v1811_v7, %v154_v11  ;;  %vm141_vm10 = vmor %vm139_vm9, %vm140_vm7  ;;  %v529_v61 = vmul.f32 0.0, %v2127_v57  ;;  %v355_v9 = vlaneseq }
 0x112   :  { %v135_v15 = vmul.f32 %v1813_v8, %v134_v12  ;;  %v163_v16 = vmul.f32 %v132_v14, %v2023_v20  ;;  %v152_v32 = vsel %vm151_vm8, %v1809_v0, %v148_v26  ;;  %v1669_v14 = vld [vmem:[%s2904_s9 + $0x70] sm:$0xff] }
 0x113   :  { %v156_v27 = vmul.f32 0.5, %v155_v21  ;;  %v165_v36 = vmul.f32 %v152_v32, %v2021_v19  ;;  %v199_v19 = vld [vmem:[%s2899_s4] sm:$0x3]  ;;  %v533_v4 = vadd.f32 %v529_v61, %v490_v60  ;;  %v2344_v60 = vld [vmem:[%s2900_s5 + $0xa] ss:$0 sm:$0xff]  ;;  %s1714_s4 = sshll.u32 %s2906_s11, 4  ;;  %s1715_s4 = int_to_ptr.hbm [resolvable:$true] %s1714_s4 }
 0x114   :  { %v136_v22 = vmul.f32 0.5, %v135_v15  ;;  %v171_v23 = vmul.f32 %v1767_v13, %v163_v16  ;;  %v202_v43 = vperm.slane %v199_v19, 1  ;;  %v2143_v10 = vperm.slane %v199_v19, 0 }
 0x115   :  { %v157_v33 = vsub.f32 1.5, %v156_v27  ;;  %v173_v38 = vmul.f32 %v1767_v13, %v165_v36  ;;  %v576_v21 = vadd.f32 %v572_v5, %v533_v4 }
 0x116   :  { %v137_v24 = vsub.f32 1.5, %v136_v22  ;;  %v179_v25 = vadd.f32 %v1768_v17, %v171_v23  ;;  %v615_v22 = vmul.f32 0.0, %v2141_v6 }
 0x117   :  { %v158_v37 = vmul.f32 %v1811_v7, %v157_v33  ;;  %v181_v40 = vadd.f32 %v1768_v17, %v173_v38  ;;  %v1666_v38 = vld [vmem:[%s2904_s9 + $0x58] sm:$0xff] }
 0x118   :  { %v138_v28 = vmul.f32 %v1813_v8, %v137_v24  ;;  %1728 = vmatmul.msk.f32.vlgmr.msra.gmra.mxu0 %vm2907_vm0, %v179_v25  ;;  %1732 = vmatmul.msk.f32.vlgmr.msra.gmra.mxu1 %vm2907_vm0, %v179_v25  ;;  %v2156_v24 = vshrl.u32 %v355_v9, 7  ;;  %v2161_v25 = vld [vmem:[%s2900_s5 + $0x5] ss:$0 sm:$0xff] }
 0x119   :  { %v162_v39 = vsel %vm161_vm13, %v1811_v7, %v158_v37 }
 0x11a   :  { %v142_v20 = vsel %vm141_vm10, %v1813_v8, %v138_v28  ;;  %v166_v41 = vmul.f32 %v162_v39, %v2033_v29  ;;  %v359_v39 = vadd.s32 24, %v2156_v24  ;;  %vm412_vm4 = vcmp.lt.s32.totalorder %v2156_v24, 7 }
 0x11b   :  { %v164_v31 = vmul.f32 %v142_v20, %v2035_v30  ;;  %vm455_vm5 = vcmp.lt.s32.totalorder %v2156_v24, 6  ;;  %vm498_vm8 = vcmp.lt.s32.totalorder %v2156_v24, 5  ;;  %vm541_vm9 = vcmp.lt.s32.totalorder %v2156_v24, 4 }
 0x11c   :  { %v174_v30 = vmul.f32 %v1767_v13, %v166_v41  ;;  %vm584_vm11 = vcmp.lt.s32.totalorder %v2156_v24, 3  ;;  %vm627_vm12 = vcmp.lt.s32.totalorder %v2156_v24, 2  ;;  %vm2908_vm13 = vcmp.lt.s32.totalorder %v2156_v24, 1 }
 0x11d   :  { %v172_v34 = vmul.f32 %v1767_v13, %v164_v31  ;;  %v1670_v13 = vld [vmem:[%s2904_s9 + $0x78] sm:$0xff]  ;;  %v1667_v31 = vld [vmem:[%s2904_s9 + $0x60] sm:$0xff] }
 0x11e   :  { %v182_v42 = vadd.f32 %v1768_v17, %v174_v30  ;;  %1675 = vmatpush.msra.mxu2 %v1670_v13  ;;  %1744 = vmatpush.msra.mxu3 %v1670_v13 }
 0x11f   :  { %v180_v35 = vadd.f32 %v1768_v17, %v172_v34  ;;  %v357_v34 = vadd.s32 8, %v2156_v24 }
 0x120   :  { %1676 = vmatpush.msra.mxu2 %v1669_v14  ;;  %1745 = vmatpush.msra.mxu3 %v1669_v14 }
 0x121   :  { %1729 = vmatmul.msk.f32.gmra.mxu0 %vm2907_vm0, %v180_v35  ;;  %1733 = vmatmul.msk.f32.gmra.mxu1 %vm2907_vm0, %v180_v35  ;;  %v358_v35 = vadd.s32 16, %v2156_v24 }
 0x122   :  { %1677 = vmatpush.msra.mxu2 %v1668_v18  ;;  %1746 = vmatpush.msra.mxu3 %v1668_v18 }
 0x124   :  { %1678 = vmatpush.msra.mxu2 %v1667_v31  ;;  %1747 = vmatpush.msra.mxu3 %v1667_v31 }
 0x126   :  { %1679 = vmatpush.msra.mxu2 %v1666_v38  ;;  %1748 = vmatpush.msra.mxu3 %v1666_v38 }
 0x129   :  { %1730 = vmatmul.msk.f32.gmra.mxu0 %vm2907_vm0, %v181_v40  ;;  %1734 = vmatmul.msk.f32.gmra.mxu1 %vm2907_vm0, %v181_v40  ;;  %v619_v40 = vadd.f32 %v615_v22, %v576_v21 }
 0x131   :  { %1731 = vmatmul.msk.f32.gmra.mxu0 %vm2907_vm0, %v182_v42  ;;  %1735 = vmatmul.msk.f32.gmra.mxu1 %vm2907_vm0, %v182_v42  ;;  %v658_v42 = vmul.f32 0.0, %v2161_v25 }
 0x133   :  { %v662_v61 = vadd.f32 %v658_v42, %v619_v40 }
 0x195   :  { %v263_v44 = vpop.f32.mrf.mxu1  ;;  %v234_v46 = vpop.f32.mrf.mxu0 }
 0x196   :  { %v264_v45 = vadd.f32 %v263_v44, %v202_v43  ;;  %v235_v27 = vadd.f32 %v234_v46, %v2143_v10  ;;  %v1665_v46 = vld [vmem:[%s2904_s9 + $0x50] sm:$0xff] }
 0x197   :  { %1680 = vmatpush.msra.mxu2 %v1665_v46  ;;  %1749 = vmatpush.msra.mxu3 %v1665_v46 }
 0x198   :  { %v1736_v47 = vmul.f32 -1.442695, %v264_v45 }
 0x199   :  { %1681 = vmatpush.msra.mxu2 %v1664_v56  ;;  %1750 = vmatpush.msra.mxu3 %v1664_v56 }
 0x19a   :  { %1814 = vpow2.f32 %v1736_v47 }
 0x19e   :  { %v266_v29 = vpop.f32.mrf.mxu1  ;;  %v2120_v54 = vpop.f32.mrf.mxu0 }
 0x19f   :  { %v267_v48 = vadd.f32 %v266_v29, %v202_v43 }
 0x1a0   :  { %v1815_v51 = vpop.eup %1814 }
 0x1a1   :  { %v287_v52 = vadd.f32 1.0, %v1815_v51  ;;  %v1737_v53 = vmul.f32 -1.442695, %v267_v48  ;;  %v2195_v48 = vand.u32 15, %v2156_v24  ;;  %v2197_v51 = vand.u32 15, %v357_v34 }
 0x1a3   :  { %1816 = vrcp.f32 %v287_v52  ;;  %v300_v11 = vand.u32 2147483647, %v287_v52  ;;  %v302_v12 = vand.u32 2147483648, %v287_v52  ;;  %vm296_vm15 = vweird.f32 %v287_v52 }
 0x1a4   :  { %1818 = vpow2.f32 %v1737_v53  ;;  %v2204_v53 = vld [vmem:[%s2900_s5 + $0x6] ss:$0 sm:$0xff] }
 0x1a5   :  { %vm301_vm2 = vcmp.eq.f32.partialorder %v300_v11, 8.507059e+37  ;;  %v303_v28 = vor.u32 1.1754944e-38, %v302_v12  ;;  %v2245_v11 = vld [vmem:[%s2900_s5 + $0x7] ss:$0 sm:$0xff] }
 0x1a6   :  { %v269_v58 = vpop.f32.mrf.mxu1  ;;  %v240_v8 = vpop.f32.mrf.mxu0  ;;  %v735_v31 = vmul.f32 0.0, %v2245_v11 }
 0x1a7   :  { %v270_v59 = vadd.f32 %v269_v58, %v202_v43  ;;  %v2189_v45 = vadd.f32 %v240_v8, %v2143_v10  ;;  %v2212_v58 = vand.u32 15, %v359_v39 }
 0x1a9   :  { %v1817_v63 = vpop.eup %1816  ;;  %v1738_v0 = vmul.f32 -1.442695, %v270_v59 }
 0x1aa   :  { %v1819_v1 = vpop.eup %1818  ;;  %v292_v2 = vmul.f32 %v1817_v63, %v287_v52  ;;  %vm297_vm14 = vweird.f32 %v1817_v63  ;;  %v2199_v52 = vand.u32 15, %v358_v35 }
 0x1ab   :  { %v2135_v3 = vadd.f32 1.0, %v1819_v1  ;;  %1820 = vpow2.f32 %v1738_v0  ;;  %vm298_vm1 = vmor %vm296_vm15, %vm297_vm14 }
 0x1ac   :  { %v293_v7 = vsub.f32 1.0, %v292_v2  ;;  %v1663_v2 = vld [vmem:[%s2904_s9 + $0x40] sm:$0xff] }
 0x1ad   :  { %1822 = vrcp.f32 %v2135_v3  ;;  %v315_v30 = vand.u32 2147483647, %v2135_v3  ;;  %v317_v44 = vand.u32 2147483648, %v2135_v3  ;;  %vm311_vm3 = vweird.f32 %v2135_v3  ;;  %1682 = vmatpush.msra.mxu2 %v1663_v2  ;;  %1751 = vmatpush.msra.mxu3 %v1663_v2 }
 0x1ae   :  { %v294_v15 = vmul.f32 %v1817_v63, %v293_v7  ;;  %v272_v16 = vpop.f32.mrf.mxu1  ;;  %v243_v29 = vpop.f32.mrf.mxu0 }
 0x1af   :  { %v273_v17 = vadd.f32 %v272_v16, %v202_v43  ;;  %v238_v43 = vadd.f32 %v2120_v54, %v2143_v10  ;;  %vm2218_vm7 = vcmp.eq.f32.partialorder %v315_v30, 8.507059e+37  ;;  %v318_v0 = vor.u32 1.1754944e-38, %v317_v44  ;;  %v2296_v30 = vld [vmem:[%s2900_s5 + $0x8] ss:$0 sm:$0xff] }
 0x1b0   :  { %v295_v23 = vadd.f32 %v1817_v63, %v294_v15  ;;  %v2226_v1 = vadd.f32 %v243_v29, %v2143_v10  ;;  %v701_v10 = vmul.f32 0.0, %v2204_v53  ;;  %v1662_v15 = vld [vmem:[%s2904_s9 + $0x38] sm:$0xff]  ;;  %v2309_v29 = vld [vmem:[%s2900_s5 + $0x9] ss:$0 sm:$0xff] }
 0x1b1   :  { %v1821_v26 = vpop.eup %1820  ;;  %v1739_v20 = vmul.f32 -1.442695, %v273_v17  ;;  %1683 = vmatpush.msra.mxu2 %v1662_v15  ;;  %1752 = vmatpush.msra.mxu3 %v1662_v15 }
 0x1b2   :  { %v299_v32 = vsel %vm298_vm1, %v1817_v63, %v295_v23  ;;  %v2168_v33 = vadd.f32 1.0, %v1821_v26  ;;  %v1661_v23 = vld [vmem:[%s2904_s9 + $0x30] sm:$0xff] }
 0x1b3   :  { %v2172_v36 = vpop.eup %1822  ;;  %v304_v37 = vsel %vm301_vm2, %v303_v28, %v299_v32  ;;  %1824 = vpow2.f32 %v1739_v20  ;;  %v705_v20 = vadd.f32 %v701_v10, %v662_v61  ;;  %vm420_vm2 = vcmp.ge.s32.totalorder %v2212_v58, 15  ;;  %1684 = vmatpush.msra.mxu2 %v1661_v23  ;;  %1753 = vmatpush.msra.mxu3 %v1661_v23  ;;  %v2349_v61 = vld [vmem:[%s2900_s5 + $0xb] ss:$0 sm:$0xff] }
 0x1b4   :  { %v307_v41 = vmul.f32 %v2172_v36, %v2135_v3  ;;  %1826 = vrcp.f32 %v2168_v33  ;;  %v2183_v19 = vmul.f32 %v304_v37, %v235_v27  ;;  %v330_v54 = vand.u32 2147483647, %v2168_v33  ;;  %v1660_v37 = vld [vmem:[%s2904_s9 + $0x28] sm:$0xff] }
 0x1b5   :  { %v332_v55 = vand.u32 2147483648, %v2168_v33  ;;  %vm312_vm6 = vweird.f32 %v2172_v36  ;;  %vm326_vm10 = vweird.f32 %v2168_v33  ;;  %1685 = vmatpush.msra.mxu2 %v1660_v37  ;;  %1754 = vmatpush.msra.mxu3 %v1660_v37 }
 0x1b6   :  { %v308_v47 = vsub.f32 1.0, %v307_v41  ;;  %v408_v4 = vrot.slane %v2183_v19, 1  ;;  %v451_v9 = vrot.slane %v2183_v19, 2  ;;  %vm313_vm14 = vmor %vm311_vm3, %vm312_vm6  ;;  %vm2253_vm15 = vcmp.eq.f32.partialorder %v330_v54, 8.507059e+37 }
 0x1b7   :  { %v333_v14 = vor.u32 1.1754944e-38, %v332_v55  ;;  %v2913_v16 = vrot.slane %v2183_v19, 3  ;;  %v2912_v3 = vrot.slane %v2183_v19, 4  ;;  %v2911_v18 = vrot.slane %v2183_v19, 5 }
 0x1b8   :  { %v309_v59 = vmul.f32 %v2172_v36, %v308_v47  ;;  %v2910_v26 = vrot.slane %v2183_v19, 6  ;;  %v2909_v27 = vrot.slane %v2183_v19, 7  ;;  %v2277_v32 = vmul.f32 %v2245_v11, %v2183_v19 }
 0x1b9   :  { %v1825_v63 = vpop.eup %1824  ;;  %vm463_vm3 = vcmp.ge.s32.totalorder %v2212_v58, 14  ;;  %vm506_vm6 = vcmp.ge.s32.totalorder %v2212_v58, 13 }
 0x1ba   :  { %v2234_v5 = vpop.eup %1826  ;;  %v310_v7 = vadd.f32 %v2172_v36, %v309_v59  ;;  %v2237_v8 = vadd.f32 1.0, %v1825_v63  ;;  %v2339_v59 = vadd.f32 %v735_v31, %v705_v20 }
 0x1bb   :  { %v322_v12 = vmul.f32 %v2234_v5, %v2168_v33  ;;  %vm327_vm1 = vweird.f32 %v2234_v5 }
 0x1bc   :  { %v314_v17 = vsel %vm313_vm14, %v2172_v36, %v310_v7  ;;  %1828 = vrcp.f32 %v2237_v8  ;;  %v345_v35 = vand.u32 2147483647, %v2237_v8  ;;  %v347_v36 = vand.u32 2147483648, %v2237_v8  ;;  %vm2317_vm14 = vmor %vm326_vm10, %vm327_vm1  ;;  %v1658_v7 = vld [vmem:[%s2904_s9 + $0x18] sm:$0xff] }
 0x1bd   :  { %v319_v21 = vsel %vm2218_vm7, %v318_v0, %v314_v17  ;;  %v323_v22 = vsub.f32 1.0, %v322_v12  ;;  %vm549_vm7 = vcmp.ge.s32.totalorder %v2212_v58, 12  ;;  %vm341_vm0 = vweird.f32 %v2237_v8 }
 0x1be   :  { %v2272_v28 = vmul.f32 %v319_v21, %v238_v43  ;;  %v1659_v43 = vld [vmem:[%s2904_s9 + $0x20] sm:$0xff]  ;;  %vm2356_vm1 = vcmp.eq.f32.partialorder %v345_v35, 8.507059e+37  ;;  %v348_v15 = vor.u32 1.1754944e-38, %v347_v36  ;;  %v1656_v36 = vld [vmem:[%s2904_s9 + $0x8] sm:$0xff] }
 0x1bf   :  { %v324_v34 = vmul.f32 %v2234_v5, %v323_v22  ;;  %1686 = vmatpush.msra.mxu2 %v1659_v43  ;;  %1755 = vmatpush.msra.mxu3 %v1659_v43  ;;  %v1657_v22 = vld [vmem:[%s2904_s9 + $0x10] sm:$0xff] }
 0x1c0   :  { %v409_v38 = vrot.slane %v2272_v28, 1  ;;  %v452_v39 = vrot.slane %v2272_v28, 2  ;;  %v495_v40 = vrot.slane %v2272_v28, 3  ;;  %v538_v41 = vrot.slane %v2272_v28, 4 }
 0x1c1   :  { %v325_v42 = vadd.f32 %v2234_v5, %v324_v34  ;;  %v581_v44 = vrot.slane %v2272_v28, 5  ;;  %v624_v46 = vrot.slane %v2272_v28, 6  ;;  %v667_v47 = vrot.slane %v2272_v28, 7  ;;  %1687 = vmatpush.msra.mxu2 %v1658_v7  ;;  %1756 = vmatpush.msra.mxu3 %v1658_v7 }
 0x1c2   :  { %v2311_v54 = vpop.eup %1828  ;;  %v2328_v56 = vsel %vm412_vm4, %v408_v4, %v409_v38  ;;  %v2336_v33 = vsel %vm455_vm5, %v451_v9, %v452_v39  ;;  %v2369_v10 = vsel %vm498_vm8, %v2913_v16, %v495_v40 }
 0x1c3   :  { %v329_v63 = vsel %vm2317_vm14, %v2234_v5, %v325_v42  ;;  %v337_v0 = vmul.f32 %v2311_v54, %v2237_v8  ;;  %2926 = vst [vmem:[#allocation11_spill] sm:$0xff] %v2369_v10  ;;  %v2377_v5 = vsel %vm541_vm9, %v2912_v3, %v538_v41  ;;  %v2388_v17 = vsel %vm584_vm11, %v2911_v18, %v581_v44 }
 0x1c4   :  { %2927 = vst [vmem:[#allocation12_spill] sm:$0xff] %v2377_v5  ;;  %v334_v12 = vsel %vm2253_vm15, %v333_v14, %v329_v63  ;;  %v2396_v21 = vsel %vm627_vm12, %v2910_v26, %v624_v46  ;;  %v2410_v23 = vsel %vm2908_vm13, %v2909_v27, %v667_v47  ;;  %v2414_v20 = vmul.f32 %v2296_v30, %v2328_v56 }
 0x1c5   :  { %v2399_v13 = vmul.f32 %v334_v12, %v2189_v45  ;;  %v338_v14 = vsub.f32 1.0, %v337_v0  ;;  %vm342_vm15 = vweird.f32 %v2311_v54  ;;  %v2419_v45 = vmul.f32 %v2309_v29, %v2336_v33  ;;  %1688 = vmatpush.msra.mxu2 %v1657_v22  ;;  %1757 = vmatpush.msra.mxu3 %v1657_v22 }
 0x1c6   :  { %v2423_v31 = vmul.f32 %v2344_v60, %v2369_v10  ;;  %v2427_v34 = vmul.f32 %v2349_v61, %v2377_v5  ;;  %vm418_vm13 = vcmp.ge.s32.totalorder %v2197_v51, 15  ;;  %vm461_vm14 = vcmp.ge.s32.totalorder %v2197_v51, 14  ;;  %vm343_vm10 = vmor %vm341_vm0, %vm342_vm15 }
 0x1c7   :  { %v339_v35 = vmul.f32 %v2311_v54, %v338_v14  ;;  %v410_v37 = vrot.slane %v2399_v13, 1  ;;  %v453_v42 = vrot.slane %v2399_v13, 2  ;;  %v496_v43 = vrot.slane %v2399_v13, 3  ;;  %v1655_v14 = vld [vmem:[%s2904_s9] sm:$0xff]  ;;  %1689 = vmatpush.msra.mxu2 %v1656_v36  ;;  %1758 = vmatpush.msra.mxu3 %v1656_v36 }
 0x1c8   :  { %v539_v55 = vrot.slane %v2399_v13, 4  ;;  %v582_v63 = vrot.slane %v2399_v13, 5  ;;  %v2915_v0 = vrot.slane %v2399_v13, 6  ;;  %v2914_v7 = vrot.slane %v2399_v13, 7 }
 0x1c9   :  { %v340_v12 = vadd.f32 %v2311_v54, %v339_v35  ;;  %v2451_v22 = vsel %vm412_vm4, %v409_v38, %v410_v37  ;;  %v2457_v27 = vsel %vm455_vm5, %v452_v39, %v453_v42  ;;  %v2463_v35 = vsel %vm498_vm8, %v495_v40, %v496_v43  ;;  %1690 = vmatpush.msra.mxu2 %v1655_v14 }
 0x1ca   :  { %v440_v38 = vsel %vm420_vm2, %v2451_v22, 0.0  ;;  %v483_v39 = vsel %vm463_vm3, %v2457_v27, 0.0  ;;  %v526_v40 = vsel %vm506_vm6, %v2463_v35, 0.0  ;;  %v2484_v8 = vsel %vm541_vm9, %v538_v41, %v539_v55  ;;  %1759 = vmatpush.msra.mxu3 %v1655_v14 }
 0x1cb   :  { %vm547_vm0 = vcmp.ge.s32.totalorder %v2197_v51, 12  ;;  %v344_v36 = vsel %vm343_vm10, %v2311_v54, %v340_v12  ;;  %v446_v26 = vmul.f32 %v2113_v49, %v440_v38  ;;  %v489_v18 = vmul.f32 %v2118_v50, %v483_v39 }
 0x1cc   :  { %v532_v3 = vmul.f32 %v2127_v57, %v526_v40  ;;  %vm590_vm2 = vcmp.ge.s32.totalorder %v2197_v51, 11  ;;  %v349_v16 = vsel %vm2356_vm1, %v348_v15, %v344_v36  ;;  %v569_v41 = vsel %vm549_vm7, %v2484_v8, 0.0 }
 0x1cd   :  { %v2503_v54 = vsel %vm584_vm11, %v581_v44, %v582_v63  ;;  %v2511_v2 = vsel %vm627_vm12, %v624_v46, %v2915_v0  ;;  %vm633_vm3 = vcmp.ge.s32.totalorder %v2197_v51, 10  ;;  %v2515_v15 = vmul.f32 %v349_v16, %v2226_v1 }
 0x1ce   :  { %v493_v12 = vadd.f32 %v489_v18, %v446_v26  ;;  %v575_v14 = vmul.f32 %v2133_v62, %v569_v41  ;;  %vm2928_vm6 = vcmp.ge.s32.totalorder %v2212_v58, 11  ;;  %vm678_vm7 = vcmp.ge.s32.totalorder %v2212_v58, 9 }
 0x1cf   :  { %v612_v44 = vsel %vm2928_vm6, %v2503_v54, 0.0  ;;  %vm743_vm10 = vcmp.ge.s32.totalorder %v2195_v48, 7  ;;  %vm2929_vm1 = vcmp.ge.s32.totalorder %v2212_v58, 10  ;;  %vm2930_vm15 = vcmp.lt.s32.totalorder %v2156_v24, 1 }
 0x1d0   :  { %v618_v38 = vmul.f32 %v2141_v6, %v612_v44  ;;  %v655_v46 = vsel %vm2929_vm1, %v2511_v2, 0.0  ;;  %v2533_v1 = vsel %vm2930_vm15, %v667_v47, %v2914_v7  ;;  %v2537_v16 = vmul.f32 %v2245_v11, %v2399_v13 }
 0x1d1   :  { %v411_v18 = vrot.slane %v2515_v15, 1  ;;  %v454_v26 = vrot.slane %v2515_v15, 2  ;;  %v497_v39 = vrot.slane %v2515_v15, 3  ;;  %v536_v40 = vadd.f32 %v532_v3, %v493_v12 }
 0x1d2   :  { %vm676_vm6 = vcmp.ge.s32.totalorder %v2197_v51, 9  ;;  %v540_v36 = vrot.slane %v2515_v15, 4  ;;  %v583_v47 = vrot.slane %v2515_v15, 5  ;;  %v626_v41 = vrot.slane %v2515_v15, 6 }
 0x1d3   :  { %v661_v11 = vmul.f32 %v2161_v25, %v655_v46  ;;  %v2550_v44 = vsel %vm412_vm4, %v410_v37, %v411_v18  ;;  %v2556_v3 = vsel %vm412_vm4, %v411_v18, %v408_v4  ;;  %v2560_v12 = vsel %vm455_vm5, %v453_v42, %v454_v26 }
 0x1d4   :  { %v2566_v7 = vsel %vm455_vm5, %v454_v26, %v451_v9  ;;  %vm777_vm15 = vcmp.ge.s32.totalorder %v2195_v48, 6  ;;  %vm779_vm1 = vcmp.ge.s32.totalorder %v2199_v52, 6  ;;  %v438_v37 = vsel %vm418_vm13, %v2556_v3, 0.0 }
 0x1d5   :  { %v481_v4 = vsel %vm461_vm14, %v2566_v7, 0.0  ;;  %v2578_v42 = vsel %vm498_vm8, %v496_v43, %v497_v39  ;;  %v2931_v46 = vrot.slane %v2183_v19, 3  ;;  %v444_v18 = vmul.f32 %v2113_v49, %v438_v37 }
 0x1d6   :  { %v487_v26 = vmul.f32 %v2118_v50, %v481_v4  ;;  %vm2932_vm4 = vcmp.ge.s32.totalorder %v2197_v51, 13  ;;  %v2595_v43 = vsel %vm541_vm9, %v539_v55, %v540_v36  ;;  %vm811_vm5 = vcmp.ge.s32.totalorder %v2195_v48, 5 }
 0x1d7   :  { %v2584_v9 = vsel %vm498_vm8, %v497_v39, %v2931_v46  ;;  %vm813_vm13 = vcmp.ge.s32.totalorder %v2199_v52, 5  ;;  %v2933_v49 = vrot.slane %v2183_v19, 4  ;;  %v579_v37 = vadd.f32 %v575_v14, %v536_v40 }
 0x1d8   :  { %v524_v0 = vsel %vm2932_vm4, %v2584_v9, 0.0  ;;  %v2610_v4 = vsel %vm584_vm11, %v582_v63, %v583_v47  ;;  %v491_v55 = vadd.f32 %v487_v26, %v444_v18  ;;  %vm845_vm8 = vcmp.ge.s32.totalorder %v2195_v48, 4 }
 0x1d9   :  { %v530_v39 = vmul.f32 %v2127_v57, %v524_v0  ;;  %v2604_v50 = vsel %vm541_vm9, %v540_v36, %v2933_v49  ;;  %v2934_v57 = vrot.slane %v2183_v19, 5  ;;  %v2935_v36 = vrot.slane %v2399_v13, 6 }
 0x1da   :  { %v567_v46 = vsel %vm547_vm0, %v2604_v50, 0.0  ;;  %vm847_vm9 = vcmp.ge.s32.totalorder %v2199_v52, 4  ;;  %v622_v18 = vadd.f32 %v618_v38, %v579_v37  ;;  %v698_v38 = vsel %vm678_vm7, %v2533_v1, 0.0 }
 0x1db   :  { %v2619_v0 = vsel %vm584_vm11, %v583_v47, %v2934_v57  ;;  %v2625_v14 = vsel %vm627_vm12, %v2935_v36, %v626_v41  ;;  %v573_v63 = vmul.f32 %v2133_v62, %v567_v46  ;;  %v2936_v47 = vrot.slane %v2183_v19, 6 }
 0x1dc   :  { %v610_v40 = vsel %vm590_vm2, %v2619_v0, 0.0  ;;  %v534_v49 = vadd.f32 %v530_v39, %v491_v55  ;;  %v669_v62 = vrot.slane %v2515_v15, 7  ;;  %v665_v5 = vadd.f32 %v661_v11, %v622_v18 }
 0x1dd   :  { %v2637_v26 = vsel %vm627_vm12, %v626_v41, %v2936_v47  ;;  %v616_v57 = vmul.f32 %v2141_v6, %v610_v40  ;;  %v763_v41 = vsel %vm743_vm10, %v2556_v3, 0.0  ;;  %v2937_v6 = vrot.slane %v2399_v13, 7 }
 0x1de   :  { %v653_v36 = vsel %vm633_vm3, %v2637_v26, 0.0  ;;  %v577_v39 = vadd.f32 %v573_v63, %v534_v49  ;;  %vm2938_vm11 = vcmp.lt.s32.totalorder %v2156_v24, 1  ;;  %v2939_v55 = vrot.slane %v2183_v19, 7 }
 0x1df   :  { %v659_v46 = vmul.f32 %v2161_v25, %v653_v36  ;;  %v2655_v37 = vsel %vm2938_vm11, %v2937_v6, %v669_v62  ;;  %vm2940_vm12 = vmmov %vm2938_vm11  ;;  %v704_v11 = vmul.f32 %v2204_v53, %v698_v38  ;;  %vm2941_vm14 = vcmp.ge.s32.totalorder %v2199_v52, 7 }
 0x1e0   :  { %v2661_v25 = vsel %vm2940_vm12, %v669_v62, %v2939_v55  ;;  %v765_v63 = vsel %vm2941_vm14, %v2451_v22, 0.0  ;;  %v769_v18 = vmul.f32 %v2296_v30, %v763_v41  ;;  %v772_v47 = vmul.f32 %v2296_v30, %v2550_v44 }
 0x1e1   :  { %v696_v40 = vsel %vm676_vm6, %v2661_v25, 0.0  ;;  %v620_v49 = vadd.f32 %v616_v57, %v577_v39  ;;  %v708_v36 = vadd.f32 %v704_v11, %v665_v5  ;;  %v771_v62 = vmul.f32 %v2296_v30, %v765_v63 }
 0x1e2   :  { %v702_v24 = vmul.f32 %v2204_v53, %v696_v40  ;;  %v773_v38 = vadd.f32 %v769_v18, %v2339_v59  ;;  %v797_v6 = vsel %vm777_vm15, %v2566_v7, 0.0  ;;  %v799_v55 = vsel %vm779_vm1, %v2457_v27, 0.0 }
 0x1e3   :  { %v806_v41 = vmul.f32 %v2309_v29, %v2560_v12  ;;  %v663_v10 = vadd.f32 %v659_v46, %v620_v49  ;;  %v742_v57 = vadd.f32 %v2537_v16, %v708_v36  ;;  %v775_v53 = vadd.f32 %v771_v62, %v2339_v59  ;;  %v1781_v62 = vld [vmem:[%s2900_s5 + $0xc] ss:$0 sm:$0xff] }
 0x1e4   :  { %v803_v30 = vmul.f32 %v2309_v29, %v797_v6  ;;  %v805_v5 = vmul.f32 %v2309_v29, %v799_v55  ;;  %v831_v39 = vsel %vm811_vm5, %v2584_v9, 0.0  ;;  %v833_v11 = vsel %vm813_vm13, %v2463_v35, 0.0 }
 0x1e5   :  { %v840_v40 = vmul.f32 %v2344_v60, %v2578_v42  ;;  %v706_v46 = vadd.f32 %v702_v24, %v663_v10  ;;  %v776_v63 = vadd.f32 %v772_v47, %v742_v57  ;;  %v837_v59 = vmul.f32 %v2344_v60, %v831_v39  ;;  %v1782_v57 = vld [vmem:[%s2900_s5 + $0xd] ss:$0 sm:$0xff] }
 0x1e6   :  { %v807_v16 = vadd.f32 %v803_v30, %v773_v38  ;;  %v809_v18 = vadd.f32 %v805_v5, %v775_v53  ;;  %v839_v49 = vmul.f32 %v2344_v60, %v833_v11  ;;  %v865_v29 = vsel %vm845_vm8, %v2604_v50, 0.0 }
 0x1e7   :  { %v867_v36 = vsel %vm847_vm9, %v2484_v8, 0.0  ;;  %v740_v10 = vadd.f32 %v2277_v32, %v706_v46  ;;  %v810_v47 = vadd.f32 %v806_v41, %v776_v63  ;;  %v871_v38 = vmul.f32 %v2349_v61, %v865_v29 }
 0x1e8   :  { %v841_v24 = vadd.f32 %v837_v59, %v807_v16  ;;  %v843_v6 = vadd.f32 %v839_v49, %v809_v18  ;;  %v873_v60 = vmul.f32 %v2349_v61, %v867_v36  ;;  %v874_v55 = vmul.f32 %v2349_v61, %v2595_v43 }
 0x1e9   :  { %vm879_vm0 = vcmp.ge.s32.totalorder %v2195_v48, 3  ;;  %v774_v53 = vadd.f32 %v2414_v20, %v740_v10  ;;  %v844_v30 = vadd.f32 %v840_v40, %v810_v47  ;;  %vm881_vm2 = vcmp.ge.s32.totalorder %v2199_v52, 3 }
 0x1ea   :  { %v875_v32 = vadd.f32 %v871_v38, %v841_v24  ;;  %v877_v41 = vadd.f32 %v873_v60, %v843_v6  ;;  %v899_v5 = vsel %vm879_vm0, %v2619_v0, 0.0  ;;  %v901_v39 = vsel %vm881_vm2, %v2503_v54, 0.0  ;;  %v1784_v24 = vld [vmem:[%s2900_s5 + $0xf] ss:$0 sm:$0xff] }
 0x1eb   :  { %v906_v11 = vmul.f32 %v1781_v62, %v2388_v17  ;;  %v808_v61 = vadd.f32 %v2419_v45, %v774_v53  ;;  %v878_v46 = vadd.f32 %v874_v55, %v844_v30  ;;  %v905_v63 = vmul.f32 %v1781_v62, %v899_v5  ;;  %v1783_v45 = vld [vmem:[%s2900_s5 + $0xe] ss:$0 sm:$0xff] }
 0x1ec   :  { %v907_v16 = vmul.f32 %v1781_v62, %v901_v39  ;;  %v908_v59 = vmul.f32 %v1781_v62, %v2610_v4  ;;  %vm913_vm3 = vcmp.ge.s32.totalorder %v2195_v48, 2  ;;  %vm915_vm7 = vcmp.ge.s32.totalorder %v2199_v52, 2 }
 0x1ed   :  { %v940_v20 = vmul.f32 %v1782_v57, %v2396_v21  ;;  %v842_v40 = vadd.f32 %v2423_v31, %v808_v61  ;;  %v909_v18 = vadd.f32 %v905_v63, %v875_v32  ;;  %v933_v29 = vsel %vm913_vm3, %v2637_v26, 0.0 }
 0x1ee   :  { %v911_v49 = vadd.f32 %v907_v16, %v877_v41  ;;  %v912_v36 = vadd.f32 %v908_v59, %v878_v46  ;;  %v935_v10 = vsel %vm915_vm7, %v2511_v2, 0.0  ;;  %v939_v62 = vmul.f32 %v1782_v57, %v933_v29  ;;  %v1785_v46 = vld [vmem:[%s2900_s5 + $0x10] ss:$0 sm:$0xff] }
 0x1ef   :  { %v942_v47 = vmul.f32 %v1782_v57, %v2625_v14  ;;  %v876_v31 = vadd.f32 %v2427_v34, %v842_v40  ;;  %v941_v38 = vmul.f32 %v1782_v57, %v935_v10  ;;  %vm947_vm10 = vcmp.ge.s32.totalorder %v2195_v48, 1 }
 0x1f0   :  { %vm949_vm6 = vcmp.ge.s32.totalorder %v2199_v52, 1  ;;  %v943_v6 = vadd.f32 %v939_v62, %v909_v18  ;;  %v967_v55 = vsel %vm947_vm10, %v2661_v25, 0.0  ;;  %v974_v5 = vmul.f32 %v1783_v45, %v2410_v23 }
 0x1f1   :  { %v946_v60 = vadd.f32 %v942_v47, %v912_v36  ;;  %v969_v53 = vsel %vm949_vm6, %v2533_v1, 0.0  ;;  %v910_v30 = vadd.f32 %v906_v11, %v876_v31  ;;  %v945_v32 = vadd.f32 %v941_v38, %v911_v49  ;;  %v1787_v38 = vld [vmem:[%s2900_s5 + $0x12] ss:$0 sm:$0xff] }
 0x1f2   :  { %v973_v41 = vmul.f32 %v1783_v45, %v967_v55  ;;  %v975_v39 = vmul.f32 %v1783_v45, %v969_v53  ;;  %v976_v61 = vmul.f32 %v1783_v45, %v2655_v37  ;;  %v983_v34 = vmul.f32 %v1784_v24, %v2183_v19  ;;  %v1786_v19 = vld [vmem:[%s2900_s5 + $0x11] ss:$0 sm:$0xff] }
 0x1f3   :  { %v984_v57 = vmul.f32 %v1784_v24, %v2272_v28  ;;  %v944_v63 = vadd.f32 %v940_v20, %v910_v30  ;;  %v985_v59 = vmul.f32 %v1784_v24, %v2399_v13  ;;  %v986_v11 = vmul.f32 %v1784_v24, %v2515_v15 }
 0x1f4   :  { %v977_v16 = vadd.f32 %v973_v41, %v943_v6  ;;  %v979_v40 = vadd.f32 %v975_v39, %v945_v32  ;;  %v980_v18 = vadd.f32 %v976_v61, %v946_v60  ;;  %vm996_vm1 = vcmp.lt.s32.totalorder %v2197_v51, 15  ;;  %v2942_v61 = vld [vmem:[#allocation11_spill] sm:$0xff] }
 0x1f5   :  { %vm998_vm15 = vcmp.lt.s32.totalorder %v2212_v58, 15  ;;  %v978_v49 = vadd.f32 %v974_v5, %v944_v63  ;;  %v1012_v45 = vsel %vm996_vm1, %v2451_v22, 0.0  ;;  %v1017_v10 = vmul.f32 %v1785_v46, %v2328_v56 }
 0x1f6   :  { %v987_v29 = vadd.f32 %v983_v34, %v977_v16  ;;  %v1014_v20 = vsel %vm998_vm15, %v2556_v3, 0.0  ;;  %v989_v36 = vadd.f32 %v985_v59, %v979_v40  ;;  %v990_v13 = vadd.f32 %v986_v11, %v980_v18 }
 0x1f7   :  { %v1018_v62 = vmul.f32 %v1785_v46, %v1012_v45  ;;  %v988_v47 = vadd.f32 %v984_v57, %v978_v49  ;;  %v1019_v24 = vmul.f32 %v1785_v46, %v2550_v44  ;;  %v1020_v31 = vmul.f32 %v1785_v46, %v1014_v20  ;;  %v1789_v49 = vld [vmem:[%s2900_s5 + $0x14] ss:$0 sm:$0xff]  ;;  %v2943_v20 = vld [vmem:[#allocation12_spill] sm:$0xff] }
 0x1f8   :  { %vm1030_vm4 = vcmp.lt.s32.totalorder %v2197_v51, 14  ;;  %v1021_v6 = vadd.f32 %v1017_v10, %v987_v29  ;;  %vm1032_vm5 = vcmp.lt.s32.totalorder %v2212_v58, 14  ;;  %v1051_v55 = vmul.f32 %v1786_v19, %v2336_v33  ;;  %v1788_v33 = vld [vmem:[%s2900_s5 + $0x13] ss:$0 sm:$0xff] }
 0x1f9   :  { %v1046_v60 = vsel %vm1030_vm4, %v2457_v27, 0.0  ;;  %v1022_v53 = vadd.f32 %v1018_v62, %v988_v47  ;;  %v1023_v56 = vadd.f32 %v1019_v24, %v989_v36  ;;  %v1024_v30 = vadd.f32 %v1020_v31, %v990_v13  ;;  %v1790_v24 = vld [vmem:[%s2900_s5 + $0x15] ss:$0 sm:$0xff] }
 0x1fa   :  { %v1048_v32 = vsel %vm1032_vm5, %v2566_v7, 0.0  ;;  %v1052_v44 = vmul.f32 %v1786_v19, %v1046_v60  ;;  %v1053_v41 = vmul.f32 %v1786_v19, %v2560_v12  ;;  %v1055_v39 = vadd.f32 %v1051_v55, %v1021_v6 }
 0x1fb   :  { %v1054_v5 = vmul.f32 %v1786_v19, %v1048_v32  ;;  %vm1064_vm13 = vcmp.lt.s32.totalorder %v2197_v51, 13  ;;  %vm1066_vm8 = vcmp.lt.s32.totalorder %v2212_v58, 13  ;;  %v1085_v34 = vmul.f32 %v1787_v38, %v2942_v61 }
 0x1fc   :  { %v1087_v57 = vmul.f32 %v1787_v38, %v2578_v42  ;;  %v1056_v46 = vadd.f32 %v1052_v44, %v1022_v53  ;;  %v1057_v63 = vadd.f32 %v1053_v41, %v1023_v56  ;;  %v1080_v59 = vsel %vm1064_vm13, %v2463_v35, 0.0  ;;  %v1791_v44 = vld [vmem:[%s2900_s5 + $0x16] ss:$0 sm:$0xff] }
 0x1fd   :  { %v1058_v16 = vadd.f32 %v1054_v5, %v1024_v30  ;;  %v1082_v12 = vsel %vm1066_vm8, %v2584_v9, 0.0  ;;  %v1086_v11 = vmul.f32 %v1787_v38, %v1080_v59  ;;  %v1089_v40 = vadd.f32 %v1085_v34, %v1055_v39 }
 0x1fe   :  { %vm1098_vm9 = vcmp.lt.s32.totalorder %v2197_v51, 12  ;;  %v1088_v18 = vmul.f32 %v1787_v38, %v1082_v12  ;;  %v1091_v19 = vadd.f32 %v1087_v57, %v1057_v63  ;;  %vm1100_vm11 = vcmp.lt.s32.totalorder %v2212_v58, 12 }
 0x1ff   :  { %v1114_v42 = vsel %vm1098_vm9, %v2484_v8, 0.0  ;;  %v1090_v29 = vadd.f32 %v1086_v11, %v1056_v46  ;;  %v1116_v45 = vsel %vm1100_vm11, %v2604_v50, 0.0  ;;  %v1119_v36 = vmul.f32 %v1788_v33, %v2943_v20 }
 0x200   :  { %v1120_v13 = vmul.f32 %v1788_v33, %v1114_v42  ;;  %v1092_v10 = vadd.f32 %v1088_v18, %v1058_v16  ;;  %v1121_v62 = vmul.f32 %v1788_v33, %v2595_v43  ;;  %v1122_v47 = vmul.f32 %v1788_v33, %v1116_v45 }
 0x201   :  { %vm1132_vm12 = vcmp.lt.s32.totalorder %v2197_v51, 11  ;;  %v1123_v31 = vadd.f32 %v1119_v36, %v1089_v40  ;;  %vm1134_vm14 = vcmp.lt.s32.totalorder %v2212_v58, 11  ;;  %v1153_v56 = vmul.f32 %v1789_v49, %v2388_v17 }
 0x202   :  { %v1124_v38 = vadd.f32 %v1120_v13, %v1090_v29  ;;  %v1148_v6 = vsel %vm1132_vm12, %v2503_v54, 0.0  ;;  %v1125_v60 = vadd.f32 %v1121_v62, %v1091_v19  ;;  %v1126_v55 = vadd.f32 %v1122_v47, %v1092_v10  ;;  %v1794_v62 = vld [vmem:[%s2900_s5 + $0x19] ss:$0 sm:$0xff] }
 0x203   :  { %v1150_v53 = vsel %vm1134_vm14, %v2619_v0, 0.0  ;;  %v1154_v43 = vmul.f32 %v1789_v49, %v1148_v6  ;;  %v1155_v30 = vmul.f32 %v1789_v49, %v2610_v4  ;;  %vm1166_vm0 = vcmp.lt.s32.totalorder %v2197_v51, 10  ;;  %v1792_v4 = vld [vmem:[%s2900_s5 + $0x17] ss:$0 sm:$0xff] }
 0x204   :  { %v1156_v32 = vmul.f32 %v1789_v49, %v1150_v53  ;;  %v1157_v41 = vadd.f32 %v1153_v56, %v1123_v31  ;;  %vm1168_vm2 = vcmp.lt.s32.totalorder %v2212_v58, 10  ;;  %v1182_v5 = vsel %vm1166_vm0, %v2511_v2, 0.0 }
 0x205   :  { %v1187_v39 = vmul.f32 %v1790_v24, %v2396_v21  ;;  %v1158_v61 = vadd.f32 %v1154_v43, %v1124_v38  ;;  %v1159_v34 = vadd.f32 %v1155_v30, %v1125_v60  ;;  %v1184_v57 = vsel %vm1168_vm2, %v2637_v26, 0.0 }
 0x206   :  { %v1160_v17 = vadd.f32 %v1156_v32, %v1126_v55  ;;  %v1188_v33 = vmul.f32 %v1790_v24, %v1182_v5  ;;  %v1189_v46 = vmul.f32 %v1790_v24, %v2625_v14  ;;  %v1190_v63 = vmul.f32 %v1790_v24, %v1184_v57 }
 0x207   :  { %v1191_v16 = vadd.f32 %v1187_v39, %v1157_v41  ;;  %vm1200_vm3 = vcmp.lt.s32.totalorder %v2197_v51, 9  ;;  %vm1202_vm7 = vcmp.lt.s32.totalorder %v2212_v58, 9  ;;  %v1221_v21 = vmul.f32 %v1791_v44, %v2410_v23  ;;  %v1793_v51 = vld [vmem:[%s2900_s5 + $0x18] ss:$0 sm:$0xff] }
 0x208   :  { %v1223_v59 = vmul.f32 %v1791_v44, %v2655_v37  ;;  %v1192_v12 = vadd.f32 %v1188_v33, %v1158_v61  ;;  %v1193_v11 = vadd.f32 %v1189_v46, %v1159_v34  ;;  %v1194_v40 = vadd.f32 %v1190_v63, %v1160_v17 }
 0x209   :  { %v1216_v18 = vsel %vm1200_vm3, %v2533_v1, 0.0  ;;  %v1218_v19 = vsel %vm1202_vm7, %v2661_v25, 0.0  ;;  %v1225_v49 = vadd.f32 %v1221_v21, %v1191_v16  ;;  %v1255_v14 = vmul.f32 %v1792_v4, %v2272_v28 }
 0x20a   :  { %v1222_v42 = vmul.f32 %v1791_v44, %v1216_v18  ;;  %v1224_v58 = vmul.f32 %v1791_v44, %v1218_v19  ;;  %v1227_v29 = vadd.f32 %v1223_v59, %v1193_v11  ;;  %v1256_v23 = vmul.f32 0.0, %v1792_v4  ;;  %v1798_v19 = vld [vmem:[%s2900_s5 + $0x1d] ss:$0 sm:$0xff] }
 0x20b   :  { %v1257_v37 = vmul.f32 %v1792_v4, %v2515_v15  ;;  %v1259_v20 = vadd.f32 %v1255_v14, %v1225_v49  ;;  %vm1267_vm10 = vcmp.lt.s32.totalorder %v2195_v48, 7  ;;  %vm1269_vm6 = vcmp.lt.s32.totalorder %v2199_v52, 7 }
 0x20c   :  { %v1226_v45 = vadd.f32 %v1222_v42, %v1192_v12  ;;  %v1228_v36 = vadd.f32 %v1224_v58, %v1194_v40  ;;  %v1283_v10 = vsel %vm1267_vm10, %v2451_v22, 0.0  ;;  %v1285_v28 = vsel %vm1269_vm6, %v2556_v3, 0.0  ;;  %v1795_v22 = vld [vmem:[%s2900_s5 + $0x1a] ss:$0 sm:$0xff] }
 0x20d   :  { %v1261_v13 = vadd.f32 %v1257_v37, %v1227_v29  ;;  %v1289_v24 = vmul.f32 %v1793_v51, %v1283_v10  ;;  %v1290_v31 = vmul.f32 0.0, %v1793_v51  ;;  %v1291_v15 = vmul.f32 %v1793_v51, %v1285_v28 }
 0x20e   :  { %v1260_v47 = vadd.f32 %v1256_v23, %v1226_v45  ;;  %v1262_v38 = vadd.f32 %v1256_v23, %v1228_v36  ;;  %vm1301_vm1 = vcmp.lt.s32.totalorder %v2195_v48, 6  ;;  %vm1303_vm15 = vcmp.lt.s32.totalorder %v2199_v52, 6 }
 0x20f   :  { %v1324_v6 = vmul.f32 0.0, %v1794_v62  ;;  %v1293_v60 = vadd.f32 %v1289_v24, %v1259_v20  ;;  %v1295_v55 = vadd.f32 %v1291_v15, %v1261_v13  ;;  %v1317_v53 = vsel %vm1301_vm1, %v2457_v27, 0.0  ;;  %v1796_v27 = vld [vmem:[%s2900_s5 + $0x1b] ss:$0 sm:$0xff] }
 0x210   :  { %v1294_v3 = vadd.f32 %v1290_v31, %v1260_v47  ;;  %v1296_v56 = vadd.f32 %v1290_v31, %v1262_v38  ;;  %v1319_v43 = vsel %vm1303_vm15, %v2566_v7, 0.0  ;;  %v1323_v30 = vmul.f32 %v1794_v62, %v1317_v53 }
 0x211   :  { %vm1335_vm4 = vcmp.lt.s32.totalorder %v2195_v48, 5  ;;  %v1325_v32 = vmul.f32 %v1794_v62, %v1319_v43  ;;  %vm1337_vm5 = vcmp.lt.s32.totalorder %v2199_v52, 5  ;;  %v1358_v7 = vmul.f32 0.0, %v1795_v22 }
 0x212   :  { %v1328_v44 = vadd.f32 %v1324_v6, %v1294_v3  ;;  %v1351_v41 = vsel %vm1335_vm4, %v2463_v35, 0.0  ;;  %v1327_v5 = vadd.f32 %v1323_v30, %v1293_v60  ;;  %v1330_v39 = vadd.f32 %v1324_v6, %v1296_v56 }
 0x213   :  { %v1353_v61 = vsel %vm1337_vm5, %v2584_v9, 0.0  ;;  %v1357_v34 = vmul.f32 %v1795_v22, %v1351_v41  ;;  %v1329_v17 = vadd.f32 %v1325_v32, %v1295_v55  ;;  %vm1369_vm13 = vcmp.lt.s32.totalorder %v2195_v48, 4  ;;  %v1797_v9 = vld [vmem:[%s2900_s5 + $0x1c] ss:$0 sm:$0xff] }
 0x214   :  { %v1359_v57 = vmul.f32 %v1795_v22, %v1353_v61  ;;  %vm1371_vm8 = vcmp.lt.s32.totalorder %v2199_v52, 4  ;;  %v1385_v33 = vsel %vm1369_vm13, %v2484_v8, 0.0  ;;  %v1392_v35 = vmul.f32 0.0, %v1796_v27 }
 0x215   :  { %v1361_v4 = vadd.f32 %v1357_v34, %v1327_v5  ;;  %v1362_v46 = vadd.f32 %v1358_v7, %v1328_v44  ;;  %v1364_v16 = vadd.f32 %v1358_v7, %v1330_v39  ;;  %v1387_v21 = vsel %vm1371_vm8, %v2604_v50, 0.0 }
 0x216   :  { %v1363_v63 = vadd.f32 %v1359_v57, %v1329_v17  ;;  %v1391_v59 = vmul.f32 %v1796_v27, %v1385_v33  ;;  %v1393_v12 = vmul.f32 %v1796_v27, %v1387_v21  ;;  %vm1403_vm9 = vcmp.lt.s32.totalorder %v2195_v48, 3 }
 0x217   :  { %vm1405_vm11 = vcmp.lt.s32.totalorder %v2199_v52, 3  ;;  %v1396_v11 = vadd.f32 %v1392_v35, %v1362_v46  ;;  %v1398_v40 = vadd.f32 %v1392_v35, %v1364_v16  ;;  %v1419_v8 = vsel %vm1403_vm9, %v2503_v54, 0.0 }
 0x218   :  { %v1421_v18 = vsel %vm1405_vm11, %v2619_v0, 0.0  ;;  %v1395_v42 = vadd.f32 %v1391_v59, %v1361_v4  ;;  %v1397_v49 = vadd.f32 %v1393_v12, %v1363_v63  ;;  %v1425_v14 = vmul.f32 %v1797_v9, %v1419_v8  ;;  %v1799_v0 = vld [vmem:[%s2900_s5 + $0x1e] ss:$0 sm:$0xff] }
 0x219   :  { %v1426_v50 = vmul.f32 0.0, %v1797_v9  ;;  %v1427_v51 = vmul.f32 %v1797_v9, %v1421_v18  ;;  %vm1437_vm12 = vcmp.lt.s32.totalorder %v2195_v48, 2  ;;  %vm1439_vm14 = vcmp.lt.s32.totalorder %v2199_v52, 2 }
 0x21a   :  { %v1460_v58 = vmul.f32 0.0, %v1798_v19  ;;  %v1429_v29 = vadd.f32 %v1425_v14, %v1395_v42  ;;  %v1453_v54 = vsel %vm1437_vm12, %v2511_v2, 0.0  ;;  %v1455_v20 = vsel %vm1439_vm14, %v2637_v26, 0.0  ;;  %v1800_v26 = vld [vmem:[%s2901_s6] ss:$0 sm:$0xff] }
 0x21b   :  { %v1430_v23 = vadd.f32 %v1426_v50, %v1396_v11  ;;  %v1432_v37 = vadd.f32 %v1426_v50, %v1398_v40  ;;  %v1431_v45 = vadd.f32 %v1427_v51, %v1397_v49  ;;  %v1459_v36 = vmul.f32 %v1798_v19, %v1453_v54 }
 0x21c   :  { %vm1471_vm0 = vcmp.lt.s32.totalorder %v2195_v48, 1  ;;  %v1461_v13 = vmul.f32 %v1798_v19, %v1455_v20  ;;  %vm1473_vm2 = vcmp.lt.s32.totalorder %v2199_v52, 1  ;;  %v1494_v24 = vmul.f32 0.0, %v1799_v0 }
 0x21d   :  { %v1464_v10 = vadd.f32 %v1460_v58, %v1430_v23  ;;  %v1466_v28 = vadd.f32 %v1460_v58, %v1432_v37  ;;  %v1463_v62 = vadd.f32 %v1459_v36, %v1429_v29  ;;  %v1487_v47 = vsel %vm1471_vm0, %v2533_v1, 0.0 }
 0x21e   :  { %v1489_v2 = vsel %vm1473_vm2, %v2661_v25, 0.0  ;;  %v1465_v31 = vadd.f32 %v1461_v13, %v1431_v45  ;;  %v1493_v15 = vmul.f32 %v1799_v0, %v1487_v47  ;;  %v1931_v48 = vmov 32.0   ;;  %v1801_v45 = vld [vmem:[%s2902_s7] ss:$0 sm:$0xff] }
 0x21f   :  { %v1495_v38 = vmul.f32 %v1799_v0, %v1489_v2  ;;  %v1498_v6 = vadd.f32 %v1494_v24, %v1464_v10  ;;  %1830 = vrcp.f32 %v1931_v48  ;;  %v1500_v52 = vadd.f32 %v1494_v24, %v1466_v28  ;;  %v1802_v13 = vld [vmem:[%s2903_s8] ss:$0 sm:$0xff] }
 0x220   :  { %v1497_v22 = vadd.f32 %v1493_v15, %v1463_v62 }
 0x221   :  { %v1499_v60 = vadd.f32 %v1495_v38, %v1465_v31  ;;  %v1506_v3 = vadd.f32 %v1800_v26, %v1498_v6  ;;  %v1508_v25 = vadd.f32 %v1800_v26, %v1500_v52 }
 0x222   :  { %v1505_v55 = vadd.f32 %v1800_v26, %v1497_v22 }
 0x223   :  { %v1507_v53 = vadd.f32 %v1800_v26, %v1499_v60 }
 0x224   :  { %v1509_v1 = vadd.f32 %v1506_v3, %v1505_v55 }
 0x225   :  { %v1831_v56 = vpop.eup %1830 }
 0x226   :  { %v1510_v43 = vadd.f32 %v1509_v1, %v1507_v53  ;;  %v1519_v30 = vmul.f32 32.0, %v1831_v56  ;;  %vm1523_vm3 = vweird.f32 %v1831_v56 }
 0x228   :  { %v1511_v32 = vadd.f32 %v1510_v43, %v1508_v25  ;;  %v1520_v44 = vsub.f32 1.0, %v1519_v30 }
 0x22a   :  { %v1512_v41 = vrot.slane %v1511_v32, 4  ;;  %v1521_v5 = vmul.f32 %v1831_v56, %v1520_v44 }
 0x22c   :  { %v1513_v39 = vadd.f32 %v1512_v41, %v1511_v32  ;;  %v1522_v34 = vadd.f32 %v1831_v56, %v1521_v5 }
 0x22e   :  { %v1514_v61 = vrot.slane %v1513_v39, 2  ;;  %v1524_v7 = vsel %vm1523_vm3, %v1831_v56, %v1522_v34 }
 0x230   :  { %v1515_v27 = vadd.f32 %v1514_v61, %v1513_v39 }
 0x232   :  { %v1516_v17 = vrot.slane %v1515_v27, 1 }
 0x234   :  { %v1517_v57 = vadd.f32 %v1516_v17, %v1515_v27 }
 0x236   :  { %v1525_v4 = vmul.f32 %v1524_v7, %v1517_v57 }
 0x238   :  { %v1526_v33 = vsub.f32 %v1505_v55, %v1525_v4  ;;  %v1527_v35 = vsub.f32 %v1506_v3, %v1525_v4  ;;  %v1528_v9 = vsub.f32 %v1507_v53, %v1525_v4  ;;  %v1529_v46 = vsub.f32 %v1508_v25, %v1525_v4 }
 0x23a   :  { %v1530_v63 = vmul.f32 %v1526_v33, %v1526_v33  ;;  %v1531_v16 = vmul.f32 %v1527_v35, %v1527_v35  ;;  %v1532_v21 = vmul.f32 %v1528_v9, %v1528_v9  ;;  %v1533_v12 = vmul.f32 %v1529_v46, %v1529_v46 }
 0x23c   :  { %v1534_v59 = vadd.f32 %v1531_v16, %v1530_v63 }
 0x23e   :  { %v1535_v11 = vadd.f32 %v1534_v59, %v1532_v21 }
 0x240   :  { %v1536_v40 = vadd.f32 %v1535_v11, %v1533_v12 }
 0x242   :  { %v1537_v8 = vrot.slane %v1536_v40, 4 }
 0x244   :  { %v1538_v18 = vadd.f32 %v1537_v8, %v1536_v40 }
 0x246   :  { %v1539_v19 = vrot.slane %v1538_v18, 2 }
 0x248   :  { %v1540_v42 = vadd.f32 %v1539_v19, %v1538_v18 }
 0x24a   :  { %v1541_v49 = vrot.slane %v1540_v42, 1 }
 0x24c   :  { %v1542_v14 = vadd.f32 %v1541_v49, %v1540_v42 }
 0x24e   :  { %v1543_v50 = vmul.f32 %v1542_v14, %v1524_v7 }
 0x250   :  { %v1544_v51 = vadd.f32 1e-05, %v1543_v50 }
 0x252   :  { %1832 = vrsqrt.f32 %v1544_v51  ;;  %vm1551_vm10 = vweird.f32 %v1544_v51 }
 0x258   :  { %v1833_v58 = vpop.eup %1832 }
 0x259   :  { %v1546_v29 = vmul.f32 %v1833_v58, %v1544_v51  ;;  %vm1552_vm7 = vweird.f32 %v1833_v58 }
 0x25a   :  { %vm1553_vm6 = vmor %vm1551_vm10, %vm1552_vm7 }
 0x25b   :  { %v1547_v23 = vmul.f32 %v1833_v58, %v1546_v29 }
 0x25d   :  { %v1548_v37 = vmul.f32 0.5, %v1547_v23 }
 0x25f   :  { %v1549_v54 = vsub.f32 1.5, %v1548_v37 }
 0x261   :  { %v1550_v0 = vmul.f32 %v1833_v58, %v1549_v54 }
 0x263   :  { %v1554_v20 = vsel %vm1553_vm6, %v1833_v58, %v1550_v0 }
 0x264   :  { %v1555_v36 = vmul.f32 %v1554_v20, %v1526_v33  ;;  %v1557_v62 = vmul.f32 %v1554_v20, %v1528_v9  ;;  %v1556_v31 = vmul.f32 %v1554_v20, %v1527_v35  ;;  %v1558_v26 = vmul.f32 %v1554_v20, %v1529_v46 }
 0x266   :  { %v1563_v10 = vmul.f32 %v1801_v45, %v1555_v36  ;;  %v1565_v2 = vmul.f32 %v1801_v45, %v1557_v62  ;;  %v1564_v38 = vmul.f32 %v1801_v45, %v1556_v31  ;;  %v1566_v60 = vmul.f32 %v1801_v45, %v1558_v26 }
 0x268   :  { %v1571_v28 = vadd.f32 %v1802_v13, %v1563_v10  ;;  %v2873_v24 = vadd.f32 %v1802_v13, %v1565_v2  ;;  %v2876_v6 = vadd.f32 %v1802_v13, %v1564_v38  ;;  %v2879_v52 = vadd.f32 %v1802_v13, %v1566_v60 }
 0x26a   :  { %v1740_v47 = vmul.f32 -1.442695, %v1571_v28  ;;  %v1742_v15 = vmul.f32 -1.442695, %v2873_v24  ;;  %v1741_v22 = vmul.f32 -1.442695, %v2876_v6 }
 0x26b   :  { %v1743_v53 = vmul.f32 -1.442695, %v2879_v52 }
 0x26c   :  { %1834 = vpow2.f32 %v1740_v47  ;;  %v1803_v47 = vld [vmem:[%s2905_s10] ss:$0 sm:$0xff]  ;;  %s1933_s10 = smov 128  }
 0x26d   :  { %1836 = vpow2.f32 %v1742_v15 }
 0x26e   :  { %1838 = vpow2.f32 %v1741_v22 }
 0x272   :  { %v1835_v48 = vpop.eup %1834 }
 0x273   :  { %v1587_v3 = vadd.f32 1.0, %v1835_v48  ;;  %v1837_v55 = vpop.eup %1836 }
 0x274   :  { %v1589_v1 = vadd.f32 1.0, %v1837_v55  ;;  %v1839_v56 = vpop.eup %1838 }
 0x275   :  { %1840 = vrcp.f32 %v1587_v3  ;;  %v1588_v43 = vadd.f32 1.0, %v1839_v56  ;;  %v1600_v5 = vand.u32 2147483647, %v1587_v3  ;;  %v1602_v39 = vand.u32 2147483648, %v1587_v3 }
 0x276   :  { %1842 = vpow2.f32 %v1743_v53  ;;  %vm1596_vm15 = vweird.f32 %v1587_v3  ;;  %v1630_v33 = vand.u32 2147483647, %v1589_v1  ;;  %v1632_v35 = vand.u32 2147483648, %v1589_v1 }
 0x277   :  { %1844 = vrcp.f32 %v1589_v1  ;;  %vm1601_vm5 = vcmp.eq.f32.partialorder %v1600_v5, 8.507059e+37  ;;  %v1603_v4 = vor.u32 1.1754944e-38, %v1602_v39  ;;  %vm1626_vm8 = vweird.f32 %v1589_v1 }
 0x278   :  { %1846 = vrcp.f32 %v1588_v43  ;;  %vm1631_vm11 = vcmp.eq.f32.partialorder %v1630_v33, 8.507059e+37  ;;  %v1633_v40 = vor.u32 1.1754944e-38, %v1632_v35  ;;  %v1615_v8 = vand.u32 2147483647, %v1588_v43 }
 0x279   :  { %v1617_v18 = vand.u32 2147483648, %v1588_v43  ;;  %vm1611_vm14 = vweird.f32 %v1588_v43 }
 0x27a   :  { %vm1616_vm2 = vcmp.eq.f32.partialorder %v1615_v8, 8.507059e+37 }
 0x27b   :  { %v1841_v25 = vpop.eup %1840  ;;  %v1618_v29 = vor.u32 1.1754944e-38, %v1617_v18 }
 0x27c   :  { %v1592_v30 = vmul.f32 %v1841_v25, %v1587_v3  ;;  %v1843_v32 = vpop.eup %1842  ;;  %vm1597_vm1 = vweird.f32 %v1841_v25 }
 0x27d   :  { %v1845_v41 = vpop.eup %1844  ;;  %v1590_v61 = vadd.f32 1.0, %v1843_v32  ;;  %vm1598_vm4 = vmor %vm1596_vm15, %vm1597_vm1  ;;  %vm2944_vm1 = vcmask 523264  }
 0x27e   :  { %v1593_v44 = vsub.f32 1.0, %v1592_v30  ;;  %v1622_v27 = vmul.f32 %v1845_v41, %v1589_v1  ;;  %v1847_v57 = vpop.eup %1846  ;;  %vm1627_vm13 = vweird.f32 %v1845_v41  ;;  %vm2945_vm15 = vmmov %vm2944_vm1 }
 0x27f   :  { %1848 = vrcp.f32 %v1590_v61  ;;  %v1607_v63 = vmul.f32 %v1847_v57, %v1588_v43  ;;  %vm1628_vm9 = vmor %vm1626_vm8, %vm1627_vm13  ;;  %vm1612_vm12 = vweird.f32 %v1847_v57  ;;  %v1647_v23 = vand.u32 2147483648, %v1590_v61 }
 0x280   :  { %v1594_v34 = vmul.f32 %v1841_v25, %v1593_v44  ;;  %v1623_v7 = vsub.f32 1.0, %v1622_v27  ;;  %vm1613_vm0 = vmor %vm1611_vm14, %vm1612_vm12  ;;  %v1645_v0 = vand.u32 2147483647, %v1590_v61  ;;  %vm1641_vm7 = vweird.f32 %v1590_v61 }
 0x281   :  { %v1608_v12 = vsub.f32 1.0, %v1607_v63  ;;  %v1648_v13 = vor.u32 1.1754944e-38, %v1647_v23 }
 0x282   :  { %v1595_v17 = vadd.f32 %v1841_v25, %v1594_v34  ;;  %v1624_v46 = vmul.f32 %v1845_v41, %v1623_v7  ;;  %vm1646_vm6 = vcmp.eq.f32.partialorder %v1645_v0, 8.507059e+37 }
 0x283   :  { %v1609_v42 = vmul.f32 %v1847_v57, %v1608_v12 }
 0x284   :  { %v1599_v9 = vsel %vm1598_vm4, %v1841_v25, %v1595_v17  ;;  %v1625_v59 = vadd.f32 %v1845_v41, %v1624_v46  ;;  %vm2946_vm4 = vmmov %vm2944_vm1 }
 0x285   :  { %v1604_v16 = vsel %vm1601_vm5, %v1603_v4, %v1599_v9  ;;  %v1849_v11 = vpop.eup %1848  ;;  %v1610_v51 = vadd.f32 %v1847_v57, %v1609_v42  ;;  %vm2947_vm5 = vmmov %vm2944_vm1 }
 0x286   :  { %v1651_v21 = vmul.f32 %v1604_v16, %v1571_v28  ;;  %v1629_v19 = vsel %vm1628_vm9, %v1845_v41, %v1625_v59  ;;  %v1637_v49 = vmul.f32 %v1849_v11, %v1590_v61  ;;  %vm1642_vm3 = vweird.f32 %v1849_v11 }
 0x287   :  { %v1634_v14 = vsel %vm1631_vm11, %v1633_v40, %v1629_v19  ;;  %v1614_v37 = vsel %vm1613_vm0, %v1847_v57, %v1610_v51  ;;  %vm1643_vm10 = vmor %vm1641_vm7, %vm1642_vm3 }
 0x288   :  { %1691 = vmatmul.f32.vlgmr.msra.gmra.mxu2 %v1651_v21  ;;  %v1653_v50 = vmul.f32 %v1634_v14, %v2873_v24  ;;  %v1638_v58 = vsub.f32 1.0, %v1637_v49  ;;  %v1619_v45 = vsel %vm1616_vm2, %v1618_v29, %v1614_v37 }
 0x289   :  { %v1652_v20 = vmul.f32 %v1619_v45, %v2876_v6 }
 0x28a   :  { %1697 = vmatmul.f32.vlgmr.msra.gmra.mxu3 %v1653_v50  ;;  %v1639_v54 = vmul.f32 %v1849_v11, %v1638_v58 }
 0x28c   :  { %v1640_v36 = vadd.f32 %v1849_v11, %v1639_v54 }
 0x28e   :  { %v1644_v10 = vsel %vm1643_vm10, %v1849_v11, %v1640_v36 }
 0x28f   :  { %v1649_v28 = vsel %vm1646_vm6, %v1648_v13, %v1644_v10 }
 0x290   :  { %1694 = vmatmul.f32.gmra.mxu2 %v1652_v20  ;;  %v1654_v62 = vmul.f32 %v1649_v28, %v2879_v52 }
 0x292   :  { %1700 = vmatmul.f32.gmra.mxu3 %v1654_v62 }
 0x30b   :  { %v1692_v2 = vpop.f32.mrf.mxu2 }
 0x30c   :  { %v1693_v24 = vadd.f32 %v1803_v47, %v1692_v2 }
 0x30d   :  { %v1698_v31 = vpop.f32.mrf.mxu3 }
 0x30e   :  { %1704 = vst.msk [vmem:[#allocation7] sm:$0xff] %vm2944_vm1, %v1693_v24  ;;  %v1699_v15 = vadd.f32 %v1803_v47, %v1698_v31 }
 0x310   :  { %1706 = vst.msk [vmem:[#allocation7 + $0x10] sm:$0xff] %vm2945_vm15, %v1699_v15 }
 0x313   :  { %v1695_v38 = vpop.f32.mrf.mxu2 }
 0x314   :  { %v1696_v6 = vadd.f32 %v1803_v47, %v1695_v38 }
 0x315   :  { %v1701_v26 = vpop.f32.mrf.mxu3 }
 0x316   :  { %1705 = vst.msk [vmem:[#allocation7 + $0x8] sm:$0xff] %vm2946_vm4, %v1696_v6  ;;  %v1702_v48 = vadd.f32 %v1803_v47, %v1701_v26 }
 0x318   :  { %1707 = vst.msk [vmem:[#allocation7 + $0x18] sm:$0xff] %vm2947_vm5, %v1702_v48 }
 0x319   :  { %1720 = dma.vmem_to_hbm [thread:$0]  %s1713_s25, 512, %s1715_s4, [#allocation4], %s1933_s10, %s1933_s10, %s1934_s27  }
 0x31a   :  { %1926 = dma.done.wait [#allocation4], 512  }
 0x31b   :  { %1927 = vsyncadd [#allocation4], 4294966784 }
 0x31c   :  { %1725 = vsyncpa [#allocation3], 1 }
 0x31d   :  { %1726 = vsyncpa [#allocation6], 1 }
 0x31e   :  { %1727 = vsyncpa [#allocation4], 1 }

</bundles_post_ra>
